<compile_context>
chip_gen: v7x
topology: tpu7x:2x2x1
jax: 0.10.0
libtpu: 0.0.40
codegen_flags: <defaults>
</compile_context>

<pallas_src>
import functools

import jax
import jax.numpy as jnp
import numpy as np
from jax.experimental import pallas as pl
from jax.experimental.pallas import tpu as pltpu

# ----------------------------- hyper params ---------------------------------
TAIL_BOUND = 1.0
MIN_BIN_W = 1e-3
MIN_BIN_H = 1e-3
MIN_DERIV = 1e-3


# --------------------------- fused IAF kernel -------------------------------
def iaf_fused_kernel(x0_ref, c_ref, pool_ref, ltri_ref, sel_ref, gat_ref, gld_ref,
                     w1c_ref, w1x_ref, b1_ref, w2_ref, b2_ref, w3_ref, b3_ref,
                     w4_ref, b4_ref,
                     y_ref, ld_ref, ld_acc, *, K):
    """One (batch-block nb, flow step t) grid point.

    Activations are (L, Bb*C) row matrices: positions on sublanes, the whole
    batch block on lanes (column = b_local*C + c).  Spline params come out as
    (slots, Bb*C), so per-bin selection is a (1, Bb*C) row broadcast.  The x
    state lives in the revisited y output block for the whole T loop; log_det
    accumulates in VMEM scratch and is stored once at t == T-1.
    """
    t = pl.program_id(1)
    t_last = pl.num_programs(1) - 1

    @pl.when(t == 0)
    def _init():
        y_ref[...] = x0_ref[...]                  # x state <- fresh N(0,1) noise
        ld_acc[...] = jnp.zeros_like(ld_acc)

    x = y_ref[0]                                  # (L, Bb*C) f32 current state
    bc = x.shape[1]

    # ---- conditioner: 4-layer 1x1-conv channel MLP (block-diag over batch) --
    h = (jnp.dot(c_ref[0], w1c_ref[0], preferred_element_type=jnp.float32)
         + jnp.dot(x, w1x_ref[0], preferred_element_type=jnp.float32)
         + b1_ref[0])
    h = jnp.maximum(h, 0.0)
    h = jnp.dot(h, w2_ref[0], preferred_element_type=jnp.float32) + b2_ref[0]
    h = jnp.maximum(h, 0.0)
    h = jnp.dot(h, w3_ref[0], preferred_element_type=jnp.float32) + b3_ref[0]
    h = jnp.maximum(h, 0.0)                                          # (L, Bb*H)

    # mean-pool over L on the MXU (pooling commutes with the affine layer 4)
    hbar = jnp.dot(pool_ref[...], h, preferred_element_type=jnp.float32)   # (1, Bb*H)
    praw = jnp.dot(hbar, w4_ref[0], preferred_element_type=jnp.float32)    # (1, Bb*P)

    # ---- regroup (1, Bb*P) -> (slots, Bb*C) with hoisted constant matmuls ---
    raw = jnp.dot(sel_ref[...] * praw, gat_ref[...],
                  preferred_element_type=jnp.float32) + b4_ref[0]    # (slots, Bb*C)

    w_raw = raw[0:K, :]                                              # (K, Bb*C)
    h_raw = raw[K:2 * K, :]                                          # (K, Bb*C)
    d_raw = raw[2 * K:3 * K - 1, :]                                  # (K-1, Bb*C)

    # ---- spline parameter preprocessing (softmax + cumsum-by-matmul) --------
    def knots(rp, min_bin):
        m = jnp.max(rp, axis=0, keepdims=True)
        e = jnp.exp(rp - m)
        prob = e / jnp.sum(e, axis=0, keepdims=True)
        bins = (2.0 * TAIL_BOUND) * (min_bin + (1.0 - min_bin * K) * prob)  # (K, Bb*C)
        # augmented lower-tri (K+1, K), row 0 = 0  ->  knot[0] = -TB exactly
        knot = jnp.dot(ltri_ref[...], bins,
                       preferred_element_type=jnp.float32) - TAIL_BOUND     # (K+1, Bb*C)
        return knot, bins

    cum_w, widths = knots(w_raw, MIN_BIN_W)
    cum_h, heights = knots(h_raw, MIN_BIN_H)

    sp = MIN_DERIV + jnp.maximum(d_raw, 0.0) + jnp.log(1.0 + jnp.exp(-jnp.abs(d_raw)))
    one = jnp.ones((1, bc), jnp.float32)          # boundary derivative = 1

    # ---- inverse rational-quadratic spline, vectorised over (L, Bb*C) -------
    inside = (x >= -TAIL_BOUND) & (x <= TAIL_BOUND)
    xc = jnp.clip(x, -TAIL_BOUND, TAIL_BOUND)

    zero = jnp.zeros_like(x)
    a_cw = zero; a_w = zero; a_ch = zero; a_h = zero; a_d = zero; a_dp = zero
    # TODO(synk): at production (L, C) tile sizes reduce these 6 live
    #             accumulators (bin-index select / L-tiling) to stay in-vreg.
    for k in range(K):                            # K static -> unrolled one-hot select
        left = cum_h[k:k + 1, :]
        if k == K - 1:
            mk = xc >= left                       # right edge guaranteed by clip
        else:
            mk = (xc >= left) & (xc < cum_h[k + 1:k + 2, :])
        mf = mk.astype(jnp.float32)
        a_cw = a_cw + mf * cum_w[k:k + 1, :]
        a_w = a_w + mf * widths[k:k + 1, :]
        a_ch = a_ch + mf * left
        a_h = a_h + mf * heights[k:k + 1, :]
        a_d = a_d + mf * (one if k == 0 else sp[k - 1:k, :])
        a_dp = a_dp + mf * (one if k == K - 1 else sp[k:k + 1, :])

    delta = a_h * pl.reciprocal(a_w, approx=True)          # EUP (idle slot)
    dy = xc - a_ch
    s2 = a_d + a_dp - 2.0 * delta
    qa = dy * s2 + a_h * (delta - a_d)
    qb = a_h * a_d - dy * s2
    qc = -delta * dy
    disc = jnp.maximum(qb * qb - 4.0 * qa * qc, 0.0)
    qden = -qb - jnp.sqrt(disc)
    # guard the 0/0 of the stable quadratic formula (near-linear bin, qa ~ 0)
    lin = jnp.abs(qden) < 1e-12
    qb_safe = jnp.where(jnp.abs(qb) < 1e-12, 1.0, qb)
    root = jnp.where(
        lin, -qc / qb_safe,
        (2.0 * qc) * pl.reciprocal(jnp.where(lin, 1.0, qden), approx=True))
    t1m = root * (1.0 - root)
    denom = delta + s2 * t1m
    dnum = (delta * delta) * (a_dp * root * root + 2.0 * delta * t1m
                              + a_d * (1.0 - root) * (1.0 - root))
    ld_in = 2.0 * jnp.log(denom) - jnp.log(dnum)  # inverse-spline log|det|

    x_new = jnp.where(inside, root * a_w + a_cw, x)         # linear tails: identity
    ld_el = jnp.where(inside, ld_in, 0.0)

    y_ref[0] = x_new
    # (1/L)*sum over positions, then per-batch channel-group sum -> lanes [0, Bb)
    ld_row = jnp.dot(pool_ref[...], ld_el, preferred_element_type=jnp.float32)
    ld_acc[...] = ld_acc[...] + jnp.dot(ld_row, gld_ref[...],
                                        preferred_element_type=jnp.float32)

    @pl.when(t == t_last)
    def _finalize():
        ld_ref[...] = ld_acc[...]


# ------------------------------- wrapper -------------------------------------
def _default_batch_blocks(B):
    """2 batch blocks only on v7x (2 TensorCores/chip); 1 on v5e/v6e."""
    try:
        kind = jax.devices()[0].device_kind.lower()
    except Exception:
        kind = ""
    return 2 if ("v7" in kind and B % 2 == 0 and B >= 2) else 1


def iaf_forward(z, c, params, noise_key, *, K, T, batch_blocks=None):
    B, C, L = z.shape
    H = params["w2"].shape[-1]
    nslots = 3 * K - 1
    P = nslots * C

    NB = _default_batch_blocks(B) if batch_blocks is None else batch_blocks
    assert B % NB == 0
    Bb = B // NB
    BC, BH, BP = Bb * C, Bb * H, Bb * P

    # fresh N(0,1) noise with z's shape (torch draws fresh numpy noise)
    x0 = jax.random.normal(noise_key, (B, C, L), dtype=jnp.float32)

    def to_rows(a):  # (B, C, L) -> (NB, L, Bb*C), column index = b_local*C + c
        return a.reshape(NB, Bb, C, L).transpose(0, 3, 1, 2).reshape(NB, L, BC)

    x0_rows = to_rows(x0)
    c_rows = to_rows(c)

    # shared conditioner weights expanded to block-diagonal over the batch block
    eye_b = jnp.eye(Bb, dtype=jnp.float32)

    def bdiag(w):  # (T, m, n) -> (T, Bb*m, Bb*n)
        m, n = w.shape[1], w.shape[2]
        return jnp.einsum("ij,tmn->timjn", eye_b, w).reshape(T, Bb * m, Bb * n)

    w1c = bdiag(params["w1"][:, :C, :])           # c-half of layer 1 (no concat)
    w1x = bdiag(params["w1"][:, C:, :])           # x-half of layer 1
    w2 = bdiag(params["w2"])
    w3 = bdiag(params["w3"])
    w4 = bdiag(params["w4"])
    b1 = jnp.tile(params["b1"], (1, 1, Bb))
    b2 = jnp.tile(params["b2"], (1, 1, Bb))
    b3 = jnp.tile(params["b3"], (1, 1, Bb))
    b4 = jnp.tile(params["b4"], (1, 1, Bb))

    # ---- hoisted constants (VMEM-resident, index_map -> block 0) ------------
    pool = jnp.full((1, L), 1.0 / L, jnp.float32)                     # mean over L
    ltri = jnp.asarray(np.tril(np.ones((K + 1, K), np.float32), -1))  # aug. cumsum
    p_in = np.arange(BP) % P
    sel = jnp.asarray((p_in[None, :] // C == np.arange(nslots)[:, None])
                      .astype(np.float32))                            # (slots, Bb*P)
    gat = jnp.asarray(((np.arange(BP)[:, None] // P == np.arange(BC)[None, :] // C)
                       & (p_in[:, None] % C == np.arange(BC)[None, :] % C))
                      .astype(np.float32))                            # (Bb*P, Bb*C)
    gld_np = np.zeros((BC, 128), np.float32)                          # per-batch sum
    gld_np[np.arange(BC), np.arange(BC) // C] = 1.0
    gld = jnp.asarray(gld_np)

    kernel = functools.partial(iaf_fused_kernel, K=K)

    y_rows, ld_wide = pl.pallas_call(
        kernel,
        out_shape=(jax.ShapeDtypeStruct((NB, L, BC), jnp.float32),
                   jax.ShapeDtypeStruct((NB, 128), jnp.float32)),
        grid_spec=pltpu.PrefetchScalarGridSpec(
            num_scalar_prefetch=0,
            grid=(NB, T),
            in_specs=[
                pl.BlockSpec((1, L, BC), lambda nb, t: (nb, 0, 0)),      # noise
                pl.BlockSpec((1, L, BC), lambda nb, t: (nb, 0, 0)),      # c rows
                pl.BlockSpec((1, L), lambda nb, t: (0, 0)),              # pool
                pl.BlockSpec((K + 1, K), lambda nb, t: (0, 0)),          # ltri
                pl.BlockSpec((nslots, BP), lambda nb, t: (0, 0)),        # sel
                pl.BlockSpec((BP, BC), lambda nb, t: (0, 0)),            # gat
                pl.BlockSpec((BC, 128), lambda nb, t: (0, 0)),           # gld
                pl.BlockSpec((1, BC, BH), lambda nb, t: (t, 0, 0)),      # w1c
                pl.BlockSpec((1, BC, BH), lambda nb, t: (t, 0, 0)),      # w1x
                pl.BlockSpec((1, 1, BH), lambda nb, t: (t, 0, 0)),       # b1
                pl.BlockSpec((1, BH, BH), lambda nb, t: (t, 0, 0)),      # w2
                pl.BlockSpec((1, 1, BH), lambda nb, t: (t, 0, 0)),       # b2
                pl.BlockSpec((1, BH, BH), lambda nb, t: (t, 0, 0)),      # w3
                pl.BlockSpec((1, 1, BH), lambda nb, t: (t, 0, 0)),       # b3
                pl.BlockSpec((1, BH, BP), lambda nb, t: (t, 0, 0)),      # w4
                pl.BlockSpec((1, nslots, BC), lambda nb, t: (t, 0, 0)),  # b4
            ],
            out_specs=(pl.BlockSpec((1, L, BC), lambda nb, t: (nb, 0, 0)),  # x state
                       pl.BlockSpec((1, 128), lambda nb, t: (nb, 0))),      # log_det
            scratch_shapes=[pltpu.VMEM((1, 128), jnp.float32)],
        ),
        compiler_params=pltpu.CompilerParams(
            dimension_semantics=("parallel", "arbitrary")),
    )(x0_rows, c_rows, pool, ltri, sel, gat, gld,
      w1c, w1x, b1, w2, b2, w3, b3, w4, b4)

    x_out = y_rows.reshape(NB, L, Bb, C).transpose(0, 2, 3, 1).reshape(B, C, L)
    log_det = ld_wide[:, :Bb].reshape(B, 1)
    return x_out, log_det


# ------------------------------ parameters -----------------------------------
def init_stacked_params(key, C, H, K, T):
    """Per-step conditioner weights stacked along a leading t axis (f32)."""
    nslots = 3 * K - 1
    P = nslots * C

    def winit(k, fan_in, shape):
        return jax.random.normal(k, shape, jnp.float32) / np.sqrt(float(fan_in))

    w1l, w2l, w3l, w4l = [], [], [], []
    keys = jax.random.split(key, T)
    for t in range(T):
        k1, k2, k3, k4 = jax.random.split(keys[t], 4)
        w1l.append(winit(k1, 2 * C, (2 * C, H)))
        w2l.append(winit(k2, H, (H, H)))
        w3l.append(winit(k3, H, (H, H)))
        w4l.append(winit(k4, H, (H, P)))          # column p = slot*C + channel
    return {
        "w1": jnp.stack(w1l), "b1": jnp.zeros((T, 1, H), jnp.float32),
        "w2": jnp.stack(w2l), "b2": jnp.zeros((T, 1, H), jnp.float32),
        "w3": jnp.stack(w3l), "b3": jnp.zeros((T, 1, H), jnp.float32),
        "w4": jnp.stack(w4l), "b4": jnp.zeros((T, nslots, C), jnp.float32),
    }


# --------------------------------- main ---------------------------------------
if __name__ == "__main__":
    B, C, L = 2, 4, 16          # c_in = c_out = 4
    K, T, HIDDEN = 5, 2, 32

    root = jax.random.PRNGKey(0)
    kz, kc, knoise, kparams = jax.random.split(root, 4)

    z = jax.random.normal(kz, (B, C, L), dtype=jnp.float32)
    c = jax.random.normal(kc, (B, C, L), dtype=jnp.float32)
    params = init_stacked_params(kparams, C, HIDDEN, K, T)

    fwd = jax.jit(functools.partial(iaf_forward, K=K, T=T))
    x_out, log_det = fwd(z, c, params, knoise)
    jax.block_until_ready((x_out, log_det))

    assert x_out.shape == (B, C, L) and log_det.shape == (B, 1)
    assert bool(jnp.all(jnp.isfinite(x_out))) and bool(jnp.all(jnp.isfinite(log_det)))

    # sanity: linear-tail elements (|noise| > 1) pass through identically every
    # step; in-range elements stay inside [-1, 1] (loose tol: approx reciprocal).
    x0_chk = jax.random.normal(knoise, (B, C, L), dtype=jnp.float32)
    tails = jnp.abs(x0_chk) > TAIL_BOUND
    assert bool(jnp.all(jnp.where(tails, jnp.abs(x_out - x0_chk) < 1e-6, True)))
    assert bool(jnp.all(jnp.where(~tails, jnp.abs(x_out) <= TAIL_BOUND + 1e-2, True)))

    print("KERNEL_OK")
</pallas_src>

<mosaic_0001>
module attributes {stable_mosaic.version = 11 : i64} {
  func.func @iaf_fused_kernel(%arg0: i32, %arg1: i32, %arg2: memref<1x16x8xf32, #tpu.memory_space<vmem>>, %arg3: memref<1x16x8xf32, #tpu.memory_space<vmem>>, %arg4: memref<1x16xf32, #tpu.memory_space<vmem>>, %arg5: memref<6x5xf32, #tpu.memory_space<vmem>>, %arg6: memref<14x112xf32, #tpu.memory_space<vmem>>, %arg7: memref<112x8xf32, #tpu.memory_space<vmem>>, %arg8: memref<8x128xf32, #tpu.memory_space<vmem>>, %arg9: memref<1x8x64xf32, #tpu.memory_space<vmem>>, %arg10: memref<1x8x64xf32, #tpu.memory_space<vmem>>, %arg11: memref<1x1x64xf32, #tpu.memory_space<vmem>>, %arg12: memref<1x64x64xf32, #tpu.memory_space<vmem>>, %arg13: memref<1x1x64xf32, #tpu.memory_space<vmem>>, %arg14: memref<1x64x64xf32, #tpu.memory_space<vmem>>, %arg15: memref<1x1x64xf32, #tpu.memory_space<vmem>>, %arg16: memref<1x64x112xf32, #tpu.memory_space<vmem>>, %arg17: memref<1x14x8xf32, #tpu.memory_space<vmem>>, %arg18: memref<1x16x8xf32, #tpu.memory_space<vmem>>, %arg19: memref<1x128xf32, #tpu.memory_space<vmem>>, %arg20: memref<1x128xf32, #tpu.memory_space<vmem>>) attributes {dimension_semantics = [#tpu.dimension_semantics<parallel>, #tpu.dimension_semantics<arbitrary>], iteration_bounds = array<i64: 1, 2>, scalar_prefetch = 0 : i64, scratch_operands = 1 : i64, tpu.core_type = #tpu.core_type<tc>, window_params = [{transform_indices = @transform_0, window_bounds = array<i64: 1, 16, 8>}, {transform_indices = @transform_1, window_bounds = array<i64: 1, 16, 8>}, {pipeline_mode = #tpu.pipeline_mode<synchronous>, transform_indices = @transform_2, window_bounds = array<i64: 1, 16>}, {pipeline_mode = #tpu.pipeline_mode<synchronous>, transform_indices = @transform_3, window_bounds = array<i64: 6, 5>}, {pipeline_mode = #tpu.pipeline_mode<synchronous>, transform_indices = @transform_4, window_bounds = array<i64: 14, 112>}, {pipeline_mode = #tpu.pipeline_mode<synchronous>, transform_indices = @transform_5, window_bounds = array<i64: 112, 8>}, {pipeline_mode = #tpu.pipeline_mode<synchronous>, transform_indices = @transform_6, window_bounds = array<i64: 8, 128>}, {transform_indices = @transform_7, window_bounds = array<i64: 1, 8, 64>}, {transform_indices = @transform_8, window_bounds = array<i64: 1, 8, 64>}, {transform_indices = @transform_9, window_bounds = array<i64: 1, 1, 64>}, {transform_indices = @transform_10, window_bounds = array<i64: 1, 64, 64>}, {transform_indices = @transform_11, window_bounds = array<i64: 1, 1, 64>}, {transform_indices = @transform_12, window_bounds = array<i64: 1, 64, 64>}, {transform_indices = @transform_13, window_bounds = array<i64: 1, 1, 64>}, {transform_indices = @transform_14, window_bounds = array<i64: 1, 64, 112>}, {transform_indices = @transform_15, window_bounds = array<i64: 1, 14, 8>}, {transform_indices = @transform_16, window_bounds = array<i64: 1, 16, 8>}, {transform_indices = @transform_17, window_bounds = array<i64: 1, 128>}]} {
    %c0_i32 = arith.constant 0 : i32
    %0 = arith.cmpi eq, %arg1, %c0_i32 : i32
    %1 = arith.extui %0 : i1 to i32
    %c0_i32_0 = arith.constant 0 : i32
    %2 = arith.cmpi ne, %1, %c0_i32_0 : i32
    scf.if %2 {
      %c0_107 = arith.constant 0 : index
      %c0_108 = arith.constant 0 : index
      %c0_109 = arith.constant 0 : index
      %358 = vector.load %arg2[%c0_107, %c0_108, %c0_109] : memref<1x16x8xf32, #tpu.memory_space<vmem>>, vector<1x16x8xf32>
      %c0_110 = arith.constant 0 : index
      %c0_111 = arith.constant 0 : index
      %c0_112 = arith.constant 0 : index
      %359 = vector.load %arg18[%c0_110, %c0_111, %c0_112] : memref<1x16x8xf32, #tpu.memory_space<vmem>>, vector<1x16x8xf32>
      tpu.vector_store %arg18[%c0_110, %c0_111, %c0_112], %358 {strides = array<i32>} : memref<1x16x8xf32, #tpu.memory_space<vmem>>, vector<1x16x8xf32>,
      %cst_113 = arith.constant 0.000000e+00 : f32
      %360 = vector.broadcast %cst_113 : f32 to vector<1x128xf32>
      %c0_114 = arith.constant 0 : index
      %c0_115 = arith.constant 0 : index
      %361 = vector.load %arg20[%c0_114, %c0_115] : memref<1x128xf32, #tpu.memory_space<vmem>>, vector<1x128xf32>
      tpu.vector_store %arg20[%c0_114, %c0_115], %360 {strides = array<i32>} : memref<1x128xf32, #tpu.memory_space<vmem>>, vector<1x128xf32>,
    } else {
    }
    %c0 = arith.constant 0 : index
    %c0_1 = arith.constant 0 : index
    %c0_2 = arith.constant 0 : index
    %3 = vector.load %arg18[%c0, %c0_1, %c0_2] : memref<1x16x8xf32, #tpu.memory_space<vmem>>, vector<1x16x8xf32>
    %4 = vector.shape_cast %3 : vector<1x16x8xf32> to vector<16x8xf32>
    %c0_3 = arith.constant 0 : index
    %c0_4 = arith.constant 0 : index
    %c0_5 = arith.constant 0 : index
    %5 = vector.load %arg3[%c0_3, %c0_4, %c0_5] : memref<1x16x8xf32, #tpu.memory_space<vmem>>, vector<1x16x8xf32>
    %6 = vector.shape_cast %5 : vector<1x16x8xf32> to vector<16x8xf32>
    %c0_6 = arith.constant 0 : index
    %c0_7 = arith.constant 0 : index
    %c0_8 = arith.constant 0 : index
    %7 = vector.load %arg9[%c0_6, %c0_7, %c0_8] : memref<1x8x64xf32, #tpu.memory_space<vmem>>, vector<1x8x64xf32>
    %8 = vector.shape_cast %7 : vector<1x8x64xf32> to vector<8x64xf32>
    %cst = arith.constant dense<0.000000e+00> : vector<16x64xf32>
    %9 = tpu.matmul %6, %8, %cst {dimension_numbers = #tpu.dot_dimension_numbers<[1], [0], [0], [1], [0, 0, 1, 1], [], []>} : vector<16x8xf32>, vector<8x64xf32>, vector<16x64xf32> -> vector<16x64xf32>
    %c0_9 = arith.constant 0 : index
    %c0_10 = arith.constant 0 : index
    %c0_11 = arith.constant 0 : index
    %10 = vector.load %arg10[%c0_9, %c0_10, %c0_11] : memref<1x8x64xf32, #tpu.memory_space<vmem>>, vector<1x8x64xf32>
    %11 = vector.shape_cast %10 : vector<1x8x64xf32> to vector<8x64xf32>
    %cst_12 = arith.constant dense<0.000000e+00> : vector<16x64xf32>
    %12 = tpu.matmul %4, %11, %cst_12 {dimension_numbers = #tpu.dot_dimension_numbers<[1], [0], [0], [1], [0, 0, 1, 1], [], []>} : vector<16x8xf32>, vector<8x64xf32>, vector<16x64xf32> -> vector<16x64xf32>
    %13 = arith.addf %9, %12 : vector<16x64xf32>
    %c0_13 = arith.constant 0 : index
    %c0_14 = arith.constant 0 : index
    %c0_15 = arith.constant 0 : index
    %14 = vector.load %arg11[%c0_13, %c0_14, %c0_15] : memref<1x1x64xf32, #tpu.memory_space<vmem>>, vector<1x1x64xf32>
    %15 = vector.shape_cast %14 : vector<1x1x64xf32> to vector<1x64xf32>
    %16 = vector.broadcast %15 : vector<1x64xf32> to vector<16x64xf32>
    %17 = arith.addf %13, %16 : vector<16x64xf32>
    %cst_16 = arith.constant 0.000000e+00 : f32
    %18 = vector.broadcast %cst_16 : f32 to vector<16x64xf32>
    %19 = arith.maximumf %17, %18 : vector<16x64xf32>
    %c0_17 = arith.constant 0 : index
    %c0_18 = arith.constant 0 : index
    %c0_19 = arith.constant 0 : index
    %20 = vector.load %arg12[%c0_17, %c0_18, %c0_19] : memref<1x64x64xf32, #tpu.memory_space<vmem>>, vector<1x64x64xf32>
    %21 = vector.shape_cast %20 : vector<1x64x64xf32> to vector<64x64xf32>
    %cst_20 = arith.constant dense<0.000000e+00> : vector<16x64xf32>
    %22 = tpu.matmul %19, %21, %cst_20 {dimension_numbers = #tpu.dot_dimension_numbers<[1], [0], [0], [1], [0, 0, 1, 1], [], []>} : vector<16x64xf32>, vector<64x64xf32>, vector<16x64xf32> -> vector<16x64xf32>
    %c0_21 = arith.constant 0 : index
    %c0_22 = arith.constant 0 : index
    %c0_23 = arith.constant 0 : index
    %23 = vector.load %arg13[%c0_21, %c0_22, %c0_23] : memref<1x1x64xf32, #tpu.memory_space<vmem>>, vector<1x1x64xf32>
    %24 = vector.shape_cast %23 : vector<1x1x64xf32> to vector<1x64xf32>
    %25 = vector.broadcast %24 : vector<1x64xf32> to vector<16x64xf32>
    %26 = arith.addf %22, %25 : vector<16x64xf32>
    %cst_24 = arith.constant 0.000000e+00 : f32
    %27 = vector.broadcast %cst_24 : f32 to vector<16x64xf32>
    %28 = arith.maximumf %26, %27 : vector<16x64xf32>
    %c0_25 = arith.constant 0 : index
    %c0_26 = arith.constant 0 : index
    %c0_27 = arith.constant 0 : index
    %29 = vector.load %arg14[%c0_25, %c0_26, %c0_27] : memref<1x64x64xf32, #tpu.memory_space<vmem>>, vector<1x64x64xf32>
    %30 = vector.shape_cast %29 : vector<1x64x64xf32> to vector<64x64xf32>
    %cst_28 = arith.constant dense<0.000000e+00> : vector<16x64xf32>
    %31 = tpu.matmul %28, %30, %cst_28 {dimension_numbers = #tpu.dot_dimension_numbers<[1], [0], [0], [1], [0, 0, 1, 1], [], []>} : vector<16x64xf32>, vector<64x64xf32>, vector<16x64xf32> -> vector<16x64xf32>
    %c0_29 = arith.constant 0 : index
    %c0_30 = arith.constant 0 : index
    %c0_31 = arith.constant 0 : index
    %32 = vector.load %arg15[%c0_29, %c0_30, %c0_31] : memref<1x1x64xf32, #tpu.memory_space<vmem>>, vector<1x1x64xf32>
    %33 = vector.shape_cast %32 : vector<1x1x64xf32> to vector<1x64xf32>
    %34 = vector.broadcast %33 : vector<1x64xf32> to vector<16x64xf32>
    %35 = arith.addf %31, %34 : vector<16x64xf32>
    %cst_32 = arith.constant 0.000000e+00 : f32
    %36 = vector.broadcast %cst_32 : f32 to vector<16x64xf32>
    %37 = arith.maximumf %35, %36 : vector<16x64xf32>
    %c0_33 = arith.constant 0 : index
    %c0_34 = arith.constant 0 : index
    %38 = vector.load %arg4[%c0_33, %c0_34] : memref<1x16xf32, #tpu.memory_space<vmem>>, vector<1x16xf32>
    %cst_35 = arith.constant dense<0.000000e+00> : vector<1x64xf32>
    %39 = tpu.matmul %38, %37, %cst_35 {dimension_numbers = #tpu.dot_dimension_numbers<[1], [0], [0], [1], [0, 0, 1, 1], [], []>} : vector<1x16xf32>, vector<16x64xf32>, vector<1x64xf32> -> vector<1x64xf32>
    %c0_36 = arith.constant 0 : index
    %c0_37 = arith.constant 0 : index
    %c0_38 = arith.constant 0 : index
    %40 = vector.load %arg16[%c0_36, %c0_37, %c0_38] : memref<1x64x112xf32, #tpu.memory_space<vmem>>, vector<1x64x112xf32>
    %41 = vector.shape_cast %40 : vector<1x64x112xf32> to vector<64x112xf32>
    %cst_39 = arith.constant dense<0.000000e+00> : vector<1x112xf32>
    %42 = tpu.matmul %39, %41, %cst_39 {dimension_numbers = #tpu.dot_dimension_numbers<[1], [0], [0], [1], [0, 0, 1, 1], [], []>} : vector<1x64xf32>, vector<64x112xf32>, vector<1x112xf32> -> vector<1x112xf32>
    %c0_40 = arith.constant 0 : index
    %c0_41 = arith.constant 0 : index
    %43 = vector.load %arg6[%c0_40, %c0_41] : memref<14x112xf32, #tpu.memory_space<vmem>>, vector<14x112xf32>
    %44 = vector.broadcast %42 : vector<1x112xf32> to vector<14x112xf32>
    %45 = arith.mulf %43, %44 : vector<14x112xf32>
    %c0_42 = arith.constant 0 : index
    %c0_43 = arith.constant 0 : index
    %46 = vector.load %arg7[%c0_42, %c0_43] : memref<112x8xf32, #tpu.memory_space<vmem>>, vector<112x8xf32>
    %cst_44 = arith.constant dense<0.000000e+00> : vector<14x8xf32>
    %47 = tpu.matmul %45, %46, %cst_44 {dimension_numbers = #tpu.dot_dimension_numbers<[1], [0], [0], [1], [0, 0, 1, 1], [], []>} : vector<14x112xf32>, vector<112x8xf32>, vector<14x8xf32> -> vector<14x8xf32>
    %c0_45 = arith.constant 0 : index
    %c0_46 = arith.constant 0 : index
    %c0_47 = arith.constant 0 : index
    %48 = vector.load %arg17[%c0_45, %c0_46, %c0_47] : memref<1x14x8xf32, #tpu.memory_space<vmem>>, vector<1x14x8xf32>
    %49 = vector.shape_cast %48 : vector<1x14x8xf32> to vector<14x8xf32>
    %50 = arith.addf %47, %49 : vector<14x8xf32>
    %51 = vector.extract_strided_slice %50 {offsets = [0, 0], sizes = [5, 8], strides = [1, 1]} : vector<14x8xf32> to vector<5x8xf32>
    %52 = vector.extract_strided_slice %50 {offsets = [5, 0], sizes = [5, 8], strides = [1, 1]} : vector<14x8xf32> to vector<5x8xf32>
    %53 = vector.extract_strided_slice %50 {offsets = [10, 0], sizes = [4, 8], strides = [1, 1]} : vector<14x8xf32> to vector<4x8xf32>
    %cst_48 = arith.constant dense<0xFF800000> : vector<8xf32>
    %54 = vector.multi_reduction <maximumf>, %51, %cst_48 [0] : vector<5x8xf32> to vector<8xf32>
    %55 = vector.shape_cast %54 : vector<8xf32> to vector<1x8xf32>
    %56 = vector.broadcast %55 : vector<1x8xf32> to vector<5x8xf32>
    %57 = arith.subf %51, %56 : vector<5x8xf32>
    %58 = math.exp %57 : vector<5x8xf32>
    %cst_49 = arith.constant dense<0.000000e+00> : vector<8xf32>
    %59 = vector.multi_reduction <add>, %58, %cst_49 [0] : vector<5x8xf32> to vector<8xf32>
    %60 = vector.shape_cast %59 : vector<8xf32> to vector<1x8xf32>
    %61 = vector.broadcast %60 : vector<1x8xf32> to vector<5x8xf32>
    %62 = arith.divf %58, %61 : vector<5x8xf32>
    %cst_50 = arith.constant 9.950000e-01 : f32
    %63 = vector.broadcast %cst_50 : f32 to vector<5x8xf32>
    %64 = arith.mulf %63, %62 : vector<5x8xf32>
    %cst_51 = arith.constant 1.000000e-03 : f32
    %65 = vector.broadcast %cst_51 : f32 to vector<5x8xf32>
    %66 = arith.addf %65, %64 : vector<5x8xf32>
    %cst_52 = arith.constant 2.000000e+00 : f32
    %67 = vector.broadcast %cst_52 : f32 to vector<5x8xf32>
    %68 = arith.mulf %67, %66 : vector<5x8xf32>
    %c0_53 = arith.constant 0 : index
    %c0_54 = arith.constant 0 : index
    %69 = vector.load %arg5[%c0_53, %c0_54] : memref<6x5xf32, #tpu.memory_space<vmem>>, vector<6x5xf32>
    %cst_55 = arith.constant dense<0.000000e+00> : vector<6x8xf32>
    %70 = tpu.matmul %69, %68, %cst_55 {dimension_numbers = #tpu.dot_dimension_numbers<[1], [0], [0], [1], [0, 0, 1, 1], [], []>} : vector<6x5xf32>, vector<5x8xf32>, vector<6x8xf32> -> vector<6x8xf32>
    %cst_56 = arith.constant 1.000000e+00 : f32
    %71 = vector.broadcast %cst_56 : f32 to vector<6x8xf32>
    %72 = arith.subf %70, %71 : vector<6x8xf32>
    %cst_57 = arith.constant dense<0xFF800000> : vector<8xf32>
    %73 = vector.multi_reduction <maximumf>, %52, %cst_57 [0] : vector<5x8xf32> to vector<8xf32>
    %74 = vector.shape_cast %73 : vector<8xf32> to vector<1x8xf32>
    %75 = vector.broadcast %74 : vector<1x8xf32> to vector<5x8xf32>
    %76 = arith.subf %52, %75 : vector<5x8xf32>
    %77 = math.exp %76 : vector<5x8xf32>
    %cst_58 = arith.constant dense<0.000000e+00> : vector<8xf32>
    %78 = vector.multi_reduction <add>, %77, %cst_58 [0] : vector<5x8xf32> to vector<8xf32>
    %79 = vector.shape_cast %78 : vector<8xf32> to vector<1x8xf32>
    %80 = vector.broadcast %79 : vector<1x8xf32> to vector<5x8xf32>
    %81 = arith.divf %77, %80 : vector<5x8xf32>
    %cst_59 = arith.constant 9.950000e-01 : f32
    %82 = vector.broadcast %cst_59 : f32 to vector<5x8xf32>
    %83 = arith.mulf %82, %81 : vector<5x8xf32>
    %cst_60 = arith.constant 1.000000e-03 : f32
    %84 = vector.broadcast %cst_60 : f32 to vector<5x8xf32>
    %85 = arith.addf %84, %83 : vector<5x8xf32>
    %cst_61 = arith.constant 2.000000e+00 : f32
    %86 = vector.broadcast %cst_61 : f32 to vector<5x8xf32>
    %87 = arith.mulf %86, %85 : vector<5x8xf32>
    %c0_62 = arith.constant 0 : index
    %c0_63 = arith.constant 0 : index
    %88 = vector.load %arg5[%c0_62, %c0_63] : memref<6x5xf32, #tpu.memory_space<vmem>>, vector<6x5xf32>
    %cst_64 = arith.constant dense<0.000000e+00> : vector<6x8xf32>
    %89 = tpu.matmul %88, %87, %cst_64 {dimension_numbers = #tpu.dot_dimension_numbers<[1], [0], [0], [1], [0, 0, 1, 1], [], []>} : vector<6x5xf32>, vector<5x8xf32>, vector<6x8xf32> -> vector<6x8xf32>
    %cst_65 = arith.constant 1.000000e+00 : f32
    %90 = vector.broadcast %cst_65 : f32 to vector<6x8xf32>
    %91 = arith.subf %89, %90 : vector<6x8xf32>
    %cst_66 = arith.constant 0.000000e+00 : f32
    %92 = vector.broadcast %cst_66 : f32 to vector<4x8xf32>
    %93 = arith.maximumf %53, %92 : vector<4x8xf32>
    %cst_67 = arith.constant 1.000000e-03 : f32
    %94 = vector.broadcast %cst_67 : f32 to vector<4x8xf32>
    %95 = arith.addf %94, %93 : vector<4x8xf32>
    %96 = math.absf %53 : vector<4x8xf32>
    %cst_68 = arith.constant 0.000000e+00 : f32
    %97 = vector.broadcast %cst_68 : f32 to vector<4x8xf32>
    %98 = arith.subf %97, %96 : vector<4x8xf32>
    %99 = math.exp %98 : vector<4x8xf32>
    %cst_69 = arith.constant 1.000000e+00 : f32
    %100 = vector.broadcast %cst_69 : f32 to vector<4x8xf32>
    %101 = arith.addf %100, %99 : vector<4x8xf32>
    %102 = math.log %101 : vector<4x8xf32>
    %103 = arith.addf %95, %102 : vector<4x8xf32>
    %cst_70 = arith.constant 1.000000e+00 : f32
    %104 = vector.broadcast %cst_70 : f32 to vector<1x8xf32>
    %cst_71 = arith.constant -1.000000e+00 : f32
    %105 = vector.broadcast %cst_71 : f32 to vector<16x8xf32>
    %106 = arith.cmpf oge, %4, %105 : vector<16x8xf32>
    %cst_72 = arith.constant 1.000000e+00 : f32
    %107 = vector.broadcast %cst_72 : f32 to vector<16x8xf32>
    %108 = arith.cmpf ole, %4, %107 : vector<16x8xf32>
    %109 = arith.andi %106, %108 : vector<16x8xi1>
    %cst_73 = arith.constant -1.000000e+00 : f32
    %cst_74 = arith.constant 1.000000e+00 : f32
    %110 = vector.broadcast %cst_73 : f32 to vector<16x8xf32>
    %111 = arith.maximumf %110, %4 : vector<16x8xf32>
    %112 = vector.broadcast %cst_74 : f32 to vector<16x8xf32>
    %113 = arith.minimumf %112, %111 : vector<16x8xf32>
    %cst_75 = arith.constant 0.000000e+00 : f32
    %114 = vector.broadcast %cst_75 : f32 to vector<16x8xf32>
    %115 = vector.extract_strided_slice %91 {offsets = [0, 0], sizes = [1, 8], strides = [1, 1]} : vector<6x8xf32> to vector<1x8xf32>
    %116 = vector.broadcast %115 : vector<1x8xf32> to vector<16x8xf32>
    %117 = arith.cmpf oge, %113, %116 : vector<16x8xf32>
    %118 = vector.extract_strided_slice %91 {offsets = [1, 0], sizes = [1, 8], strides = [1, 1]} : vector<6x8xf32> to vector<1x8xf32>
    %119 = vector.broadcast %118 : vector<1x8xf32> to vector<16x8xf32>
    %120 = arith.cmpf olt, %113, %119 : vector<16x8xf32>
    %121 = arith.andi %117, %120 : vector<16x8xi1>
    %122 = arith.extui %121 : vector<16x8xi1> to vector<16x8xi32>
    %123 = arith.sitofp %122 : vector<16x8xi32> to vector<16x8xf32>
    %124 = vector.extract_strided_slice %72 {offsets = [0, 0], sizes = [1, 8], strides = [1, 1]} : vector<6x8xf32> to vector<1x8xf32>
    %125 = vector.broadcast %124 : vector<1x8xf32> to vector<16x8xf32>
    %126 = arith.mulf %123, %125 : vector<16x8xf32>
    %127 = arith.addf %114, %126 : vector<16x8xf32>
    %128 = vector.extract_strided_slice %68 {offsets = [0, 0], sizes = [1, 8], strides = [1, 1]} : vector<5x8xf32> to vector<1x8xf32>
    %129 = vector.broadcast %128 : vector<1x8xf32> to vector<16x8xf32>
    %130 = arith.mulf %123, %129 : vector<16x8xf32>
    %131 = arith.addf %114, %130 : vector<16x8xf32>
    %132 = vector.broadcast %115 : vector<1x8xf32> to vector<16x8xf32>
    %133 = arith.mulf %123, %132 : vector<16x8xf32>
    %134 = arith.addf %114, %133 : vector<16x8xf32>
    %135 = vector.extract_strided_slice %87 {offsets = [0, 0], sizes = [1, 8], strides = [1, 1]} : vector<5x8xf32> to vector<1x8xf32>
    %136 = vector.broadcast %135 : vector<1x8xf32> to vector<16x8xf32>
    %137 = arith.mulf %123, %136 : vector<16x8xf32>
    %138 = arith.addf %114, %137 : vector<16x8xf32>
    %139 = vector.broadcast %104 : vector<1x8xf32> to vector<16x8xf32>
    %140 = arith.mulf %123, %139 : vector<16x8xf32>
    %141 = arith.addf %114, %140 : vector<16x8xf32>
    %142 = vector.extract_strided_slice %103 {offsets = [0, 0], sizes = [1, 8], strides = [1, 1]} : vector<4x8xf32> to vector<1x8xf32>
    %143 = vector.broadcast %142 : vector<1x8xf32> to vector<16x8xf32>
    %144 = arith.mulf %123, %143 : vector<16x8xf32>
    %145 = arith.addf %114, %144 : vector<16x8xf32>
    %146 = vector.extract_strided_slice %91 {offsets = [1, 0], sizes = [1, 8], strides = [1, 1]} : vector<6x8xf32> to vector<1x8xf32>
    %147 = vector.broadcast %146 : vector<1x8xf32> to vector<16x8xf32>
    %148 = arith.cmpf oge, %113, %147 : vector<16x8xf32>
    %149 = vector.extract_strided_slice %91 {offsets = [2, 0], sizes = [1, 8], strides = [1, 1]} : vector<6x8xf32> to vector<1x8xf32>
    %150 = vector.broadcast %149 : vector<1x8xf32> to vector<16x8xf32>
    %151 = arith.cmpf olt, %113, %150 : vector<16x8xf32>
    %152 = arith.andi %148, %151 : vector<16x8xi1>
    %153 = arith.extui %152 : vector<16x8xi1> to vector<16x8xi32>
    %154 = arith.sitofp %153 : vector<16x8xi32> to vector<16x8xf32>
    %155 = vector.extract_strided_slice %72 {offsets = [1, 0], sizes = [1, 8], strides = [1, 1]} : vector<6x8xf32> to vector<1x8xf32>
    %156 = vector.broadcast %155 : vector<1x8xf32> to vector<16x8xf32>
    %157 = arith.mulf %154, %156 : vector<16x8xf32>
    %158 = arith.addf %127, %157 : vector<16x8xf32>
    %159 = vector.extract_strided_slice %68 {offsets = [1, 0], sizes = [1, 8], strides = [1, 1]} : vector<5x8xf32> to vector<1x8xf32>
    %160 = vector.broadcast %159 : vector<1x8xf32> to vector<16x8xf32>
    %161 = arith.mulf %154, %160 : vector<16x8xf32>
    %162 = arith.addf %131, %161 : vector<16x8xf32>
    %163 = vector.broadcast %146 : vector<1x8xf32> to vector<16x8xf32>
    %164 = arith.mulf %154, %163 : vector<16x8xf32>
    %165 = arith.addf %134, %164 : vector<16x8xf32>
    %166 = vector.extract_strided_slice %87 {offsets = [1, 0], sizes = [1, 8], strides = [1, 1]} : vector<5x8xf32> to vector<1x8xf32>
    %167 = vector.broadcast %166 : vector<1x8xf32> to vector<16x8xf32>
    %168 = arith.mulf %154, %167 : vector<16x8xf32>
    %169 = arith.addf %138, %168 : vector<16x8xf32>
    %170 = vector.extract_strided_slice %103 {offsets = [0, 0], sizes = [1, 8], strides = [1, 1]} : vector<4x8xf32> to vector<1x8xf32>
    %171 = vector.broadcast %170 : vector<1x8xf32> to vector<16x8xf32>
    %172 = arith.mulf %154, %171 : vector<16x8xf32>
    %173 = arith.addf %141, %172 : vector<16x8xf32>
    %174 = vector.extract_strided_slice %103 {offsets = [1, 0], sizes = [1, 8], strides = [1, 1]} : vector<4x8xf32> to vector<1x8xf32>
    %175 = vector.broadcast %174 : vector<1x8xf32> to vector<16x8xf32>
    %176 = arith.mulf %154, %175 : vector<16x8xf32>
    %177 = arith.addf %145, %176 : vector<16x8xf32>
    %178 = vector.extract_strided_slice %91 {offsets = [2, 0], sizes = [1, 8], strides = [1, 1]} : vector<6x8xf32> to vector<1x8xf32>
    %179 = vector.broadcast %178 : vector<1x8xf32> to vector<16x8xf32>
    %180 = arith.cmpf oge, %113, %179 : vector<16x8xf32>
    %181 = vector.extract_strided_slice %91 {offsets = [3, 0], sizes = [1, 8], strides = [1, 1]} : vector<6x8xf32> to vector<1x8xf32>
    %182 = vector.broadcast %181 : vector<1x8xf32> to vector<16x8xf32>
    %183 = arith.cmpf olt, %113, %182 : vector<16x8xf32>
    %184 = arith.andi %180, %183 : vector<16x8xi1>
    %185 = arith.extui %184 : vector<16x8xi1> to vector<16x8xi32>
    %186 = arith.sitofp %185 : vector<16x8xi32> to vector<16x8xf32>
    %187 = vector.extract_strided_slice %72 {offsets = [2, 0], sizes = [1, 8], strides = [1, 1]} : vector<6x8xf32> to vector<1x8xf32>
    %188 = vector.broadcast %187 : vector<1x8xf32> to vector<16x8xf32>
    %189 = arith.mulf %186, %188 : vector<16x8xf32>
    %190 = arith.addf %158, %189 : vector<16x8xf32>
    %191 = vector.extract_strided_slice %68 {offsets = [2, 0], sizes = [1, 8], strides = [1, 1]} : vector<5x8xf32> to vector<1x8xf32>
    %192 = vector.broadcast %191 : vector<1x8xf32> to vector<16x8xf32>
    %193 = arith.mulf %186, %192 : vector<16x8xf32>
    %194 = arith.addf %162, %193 : vector<16x8xf32>
    %195 = vector.broadcast %178 : vector<1x8xf32> to vector<16x8xf32>
    %196 = arith.mulf %186, %195 : vector<16x8xf32>
    %197 = arith.addf %165, %196 : vector<16x8xf32>
    %198 = vector.extract_strided_slice %87 {offsets = [2, 0], sizes = [1, 8], strides = [1, 1]} : vector<5x8xf32> to vector<1x8xf32>
    %199 = vector.broadcast %198 : vector<1x8xf32> to vector<16x8xf32>
    %200 = arith.mulf %186, %199 : vector<16x8xf32>
    %201 = arith.addf %169, %200 : vector<16x8xf32>
    %202 = vector.extract_strided_slice %103 {offsets = [1, 0], sizes = [1, 8], strides = [1, 1]} : vector<4x8xf32> to vector<1x8xf32>
    %203 = vector.broadcast %202 : vector<1x8xf32> to vector<16x8xf32>
    %204 = arith.mulf %186, %203 : vector<16x8xf32>
    %205 = arith.addf %173, %204 : vector<16x8xf32>
    %206 = vector.extract_strided_slice %103 {offsets = [2, 0], sizes = [1, 8], strides = [1, 1]} : vector<4x8xf32> to vector<1x8xf32>
    %207 = vector.broadcast %206 : vector<1x8xf32> to vector<16x8xf32>
    %208 = arith.mulf %186, %207 : vector<16x8xf32>
    %209 = arith.addf %177, %208 : vector<16x8xf32>
    %210 = vector.extract_strided_slice %91 {offsets = [3, 0], sizes = [1, 8], strides = [1, 1]} : vector<6x8xf32> to vector<1x8xf32>
    %211 = vector.broadcast %210 : vector<1x8xf32> to vector<16x8xf32>
    %212 = arith.cmpf oge, %113, %211 : vector<16x8xf32>
    %213 = vector.extract_strided_slice %91 {offsets = [4, 0], sizes = [1, 8], strides = [1, 1]} : vector<6x8xf32> to vector<1x8xf32>
    %214 = vector.broadcast %213 : vector<1x8xf32> to vector<16x8xf32>
    %215 = arith.cmpf olt, %113, %214 : vector<16x8xf32>
    %216 = arith.andi %212, %215 : vector<16x8xi1>
    %217 = arith.extui %216 : vector<16x8xi1> to vector<16x8xi32>
    %218 = arith.sitofp %217 : vector<16x8xi32> to vector<16x8xf32>
    %219 = vector.extract_strided_slice %72 {offsets = [3, 0], sizes = [1, 8], strides = [1, 1]} : vector<6x8xf32> to vector<1x8xf32>
    %220 = vector.broadcast %219 : vector<1x8xf32> to vector<16x8xf32>
    %221 = arith.mulf %218, %220 : vector<16x8xf32>
    %222 = arith.addf %190, %221 : vector<16x8xf32>
    %223 = vector.extract_strided_slice %68 {offsets = [3, 0], sizes = [1, 8], strides = [1, 1]} : vector<5x8xf32> to vector<1x8xf32>
    %224 = vector.broadcast %223 : vector<1x8xf32> to vector<16x8xf32>
    %225 = arith.mulf %218, %224 : vector<16x8xf32>
    %226 = arith.addf %194, %225 : vector<16x8xf32>
    %227 = vector.broadcast %210 : vector<1x8xf32> to vector<16x8xf32>
    %228 = arith.mulf %218, %227 : vector<16x8xf32>
    %229 = arith.addf %197, %228 : vector<16x8xf32>
    %230 = vector.extract_strided_slice %87 {offsets = [3, 0], sizes = [1, 8], strides = [1, 1]} : vector<5x8xf32> to vector<1x8xf32>
    %231 = vector.broadcast %230 : vector<1x8xf32> to vector<16x8xf32>
    %232 = arith.mulf %218, %231 : vector<16x8xf32>
    %233 = arith.addf %201, %232 : vector<16x8xf32>
    %234 = vector.extract_strided_slice %103 {offsets = [2, 0], sizes = [1, 8], strides = [1, 1]} : vector<4x8xf32> to vector<1x8xf32>
    %235 = vector.broadcast %234 : vector<1x8xf32> to vector<16x8xf32>
    %236 = arith.mulf %218, %235 : vector<16x8xf32>
    %237 = arith.addf %205, %236 : vector<16x8xf32>
    %238 = vector.extract_strided_slice %103 {offsets = [3, 0], sizes = [1, 8], strides = [1, 1]} : vector<4x8xf32> to vector<1x8xf32>
    %239 = vector.broadcast %238 : vector<1x8xf32> to vector<16x8xf32>
    %240 = arith.mulf %218, %239 : vector<16x8xf32>
    %241 = arith.addf %209, %240 : vector<16x8xf32>
    %242 = vector.extract_strided_slice %91 {offsets = [4, 0], sizes = [1, 8], strides = [1, 1]} : vector<6x8xf32> to vector<1x8xf32>
    %243 = vector.broadcast %242 : vector<1x8xf32> to vector<16x8xf32>
    %244 = arith.cmpf oge, %113, %243 : vector<16x8xf32>
    %245 = arith.extui %244 : vector<16x8xi1> to vector<16x8xi32>
    %246 = arith.sitofp %245 : vector<16x8xi32> to vector<16x8xf32>
    %247 = vector.extract_strided_slice %72 {offsets = [4, 0], sizes = [1, 8], strides = [1, 1]} : vector<6x8xf32> to vector<1x8xf32>
    %248 = vector.broadcast %247 : vector<1x8xf32> to vector<16x8xf32>
    %249 = arith.mulf %246, %248 : vector<16x8xf32>
    %250 = arith.addf %222, %249 : vector<16x8xf32>
    %251 = vector.extract_strided_slice %68 {offsets = [4, 0], sizes = [1, 8], strides = [1, 1]} : vector<5x8xf32> to vector<1x8xf32>
    %252 = vector.broadcast %251 : vector<1x8xf32> to vector<16x8xf32>
    %253 = arith.mulf %246, %252 : vector<16x8xf32>
    %254 = arith.addf %226, %253 : vector<16x8xf32>
    %255 = vector.broadcast %242 : vector<1x8xf32> to vector<16x8xf32>
    %256 = arith.mulf %246, %255 : vector<16x8xf32>
    %257 = arith.addf %229, %256 : vector<16x8xf32>
    %258 = vector.extract_strided_slice %87 {offsets = [4, 0], sizes = [1, 8], strides = [1, 1]} : vector<5x8xf32> to vector<1x8xf32>
    %259 = vector.broadcast %258 : vector<1x8xf32> to vector<16x8xf32>
    %260 = arith.mulf %246, %259 : vector<16x8xf32>
    %261 = arith.addf %233, %260 : vector<16x8xf32>
    %262 = vector.extract_strided_slice %103 {offsets = [3, 0], sizes = [1, 8], strides = [1, 1]} : vector<4x8xf32> to vector<1x8xf32>
    %263 = vector.broadcast %262 : vector<1x8xf32> to vector<16x8xf32>
    %264 = arith.mulf %246, %263 : vector<16x8xf32>
    %265 = arith.addf %237, %264 : vector<16x8xf32>
    %266 = vector.broadcast %104 : vector<1x8xf32> to vector<16x8xf32>
    %267 = arith.mulf %246, %266 : vector<16x8xf32>
    %268 = arith.addf %241, %267 : vector<16x8xf32>
    %269 = tpu.reciprocal %254 {approx = true} : vector<16x8xf32> -> vector<16x8xf32>
    %270 = arith.mulf %261, %269 : vector<16x8xf32>
    %271 = arith.subf %113, %257 : vector<16x8xf32>
    %272 = arith.addf %265, %268 : vector<16x8xf32>
    %cst_76 = arith.constant 2.000000e+00 : f32
    %273 = vector.broadcast %cst_76 : f32 to vector<16x8xf32>
    %274 = arith.mulf %273, %270 : vector<16x8xf32>
    %275 = arith.subf %272, %274 : vector<16x8xf32>
    %276 = arith.mulf %271, %275 : vector<16x8xf32>
    %277 = arith.subf %270, %265 : vector<16x8xf32>
    %278 = arith.mulf %261, %277 : vector<16x8xf32>
    %279 = arith.addf %276, %278 : vector<16x8xf32>
    %280 = arith.mulf %261, %265 : vector<16x8xf32>
    %281 = arith.mulf %271, %275 : vector<16x8xf32>
    %282 = arith.subf %280, %281 : vector<16x8xf32>
    %cst_77 = arith.constant 0.000000e+00 : f32
    %283 = vector.broadcast %cst_77 : f32 to vector<16x8xf32>
    %284 = arith.subf %283, %270 : vector<16x8xf32>
    %285 = arith.mulf %284, %271 : vector<16x8xf32>
    %286 = arith.mulf %282, %282 : vector<16x8xf32>
    %cst_78 = arith.constant 4.000000e+00 : f32
    %287 = vector.broadcast %cst_78 : f32 to vector<16x8xf32>
    %288 = arith.mulf %287, %279 : vector<16x8xf32>
    %289 = arith.mulf %288, %285 : vector<16x8xf32>
    %290 = arith.subf %286, %289 : vector<16x8xf32>
    %cst_79 = arith.constant 0.000000e+00 : f32
    %291 = vector.broadcast %cst_79 : f32 to vector<16x8xf32>
    %292 = arith.maximumf %290, %291 : vector<16x8xf32>
    %cst_80 = arith.constant 0.000000e+00 : f32
    %293 = vector.broadcast %cst_80 : f32 to vector<16x8xf32>
    %294 = arith.subf %293, %282 : vector<16x8xf32>
    %295 = math.sqrt %292 : vector<16x8xf32>
    %296 = arith.subf %294, %295 : vector<16x8xf32>
    %297 = math.absf %296 : vector<16x8xf32>
    %cst_81 = arith.constant 9.99999996E-13 : f32
    %298 = vector.broadcast %cst_81 : f32 to vector<16x8xf32>
    %299 = arith.cmpf olt, %297, %298 : vector<16x8xf32>
    %300 = math.absf %282 : vector<16x8xf32>
    %cst_82 = arith.constant 9.99999996E-13 : f32
    %301 = vector.broadcast %cst_82 : f32 to vector<16x8xf32>
    %302 = arith.cmpf olt, %300, %301 : vector<16x8xf32>
    %cst_83 = arith.constant 1.000000e+00 : f32
    %303 = vector.broadcast %cst_83 : f32 to vector<16x8xf32>
    %304 = arith.select %302, %303, %282 : vector<16x8xi1>, vector<16x8xf32>
    %cst_84 = arith.constant 0.000000e+00 : f32
    %305 = vector.broadcast %cst_84 : f32 to vector<16x8xf32>
    %306 = arith.subf %305, %285 : vector<16x8xf32>
    %307 = arith.divf %306, %304 : vector<16x8xf32>
    %cst_85 = arith.constant 2.000000e+00 : f32
    %308 = vector.broadcast %cst_85 : f32 to vector<16x8xf32>
    %309 = arith.mulf %308, %285 : vector<16x8xf32>
    %cst_86 = arith.constant 1.000000e+00 : f32
    %310 = vector.broadcast %cst_86 : f32 to vector<16x8xf32>
    %311 = arith.select %299, %310, %296 : vector<16x8xi1>, vector<16x8xf32>
    %312 = tpu.reciprocal %311 {approx = true} : vector<16x8xf32> -> vector<16x8xf32>
    %313 = arith.mulf %309, %312 : vector<16x8xf32>
    %314 = arith.select %299, %307, %313 : vector<16x8xi1>, vector<16x8xf32>
    %cst_87 = arith.constant 1.000000e+00 : f32
    %315 = vector.broadcast %cst_87 : f32 to vector<16x8xf32>
    %316 = arith.subf %315, %314 : vector<16x8xf32>
    %317 = arith.mulf %314, %316 : vector<16x8xf32>
    %318 = arith.mulf %275, %317 : vector<16x8xf32>
    %319 = arith.addf %270, %318 : vector<16x8xf32>
    %320 = arith.mulf %270, %270 : vector<16x8xf32>
    %321 = arith.mulf %268, %314 : vector<16x8xf32>
    %322 = arith.mulf %321, %314 : vector<16x8xf32>
    %cst_88 = arith.constant 2.000000e+00 : f32
    %323 = vector.broadcast %cst_88 : f32 to vector<16x8xf32>
    %324 = arith.mulf %323, %270 : vector<16x8xf32>
    %325 = arith.mulf %324, %317 : vector<16x8xf32>
    %326 = arith.addf %322, %325 : vector<16x8xf32>
    %cst_89 = arith.constant 1.000000e+00 : f32
    %327 = vector.broadcast %cst_89 : f32 to vector<16x8xf32>
    %328 = arith.subf %327, %314 : vector<16x8xf32>
    %329 = arith.mulf %265, %328 : vector<16x8xf32>
    %cst_90 = arith.constant 1.000000e+00 : f32
    %330 = vector.broadcast %cst_90 : f32 to vector<16x8xf32>
    %331 = arith.subf %330, %314 : vector<16x8xf32>
    %332 = arith.mulf %329, %331 : vector<16x8xf32>
    %333 = arith.addf %326, %332 : vector<16x8xf32>
    %334 = arith.mulf %320, %333 : vector<16x8xf32>
    %335 = math.log %319 : vector<16x8xf32>
    %cst_91 = arith.constant 2.000000e+00 : f32
    %336 = vector.broadcast %cst_91 : f32 to vector<16x8xf32>
    %337 = arith.mulf %336, %335 : vector<16x8xf32>
    %338 = math.log %334 : vector<16x8xf32>
    %339 = arith.subf %337, %338 : vector<16x8xf32>
    %340 = arith.mulf %314, %254 : vector<16x8xf32>
    %341 = arith.addf %340, %250 : vector<16x8xf32>
    %342 = arith.select %109, %341, %4 : vector<16x8xi1>, vector<16x8xf32>
    %cst_92 = arith.constant 0.000000e+00 : f32
    %343 = vector.broadcast %cst_92 : f32 to vector<16x8xf32>
    %344 = arith.select %109, %339, %343 : vector<16x8xi1>, vector<16x8xf32>
    %c0_93 = arith.constant 0 : index
    %c0_94 = arith.constant 0 : index
    %c0_95 = arith.constant 0 : index
    %345 = vector.load %arg18[%c0_93, %c0_94, %c0_95] : memref<1x16x8xf32, #tpu.memory_space<vmem>>, vector<1x16x8xf32>
    %346 = vector.shape_cast %345 : vector<1x16x8xf32> to vector<16x8xf32>
    %347 = vector.shape_cast %342 : vector<16x8xf32> to vector<1x16x8xf32>
    tpu.vector_store %arg18[%c0_93, %c0_94, %c0_95], %347 {strides = array<i32>} : memref<1x16x8xf32, #tpu.memory_space<vmem>>, vector<1x16x8xf32>,
    %c0_96 = arith.constant 0 : index
    %c0_97 = arith.constant 0 : index
    %348 = vector.load %arg4[%c0_96, %c0_97] : memref<1x16xf32, #tpu.memory_space<vmem>>, vector<1x16xf32>
    %cst_98 = arith.constant dense<0.000000e+00> : vector<1x8xf32>
    %349 = tpu.matmul %348, %344, %cst_98 {dimension_numbers = #tpu.dot_dimension_numbers<[1], [0], [0], [1], [0, 0, 1, 1], [], []>} : vector<1x16xf32>, vector<16x8xf32>, vector<1x8xf32> -> vector<1x8xf32>
    %c0_99 = arith.constant 0 : index
    %c0_100 = arith.constant 0 : index
    %350 = vector.load %arg20[%c0_99, %c0_100] : memref<1x128xf32, #tpu.memory_space<vmem>>, vector<1x128xf32>
    %c0_101 = arith.constant 0 : index
    %c0_102 = arith.constant 0 : index
    %351 = vector.load %arg8[%c0_101, %c0_102] : memref<8x128xf32, #tpu.memory_space<vmem>>, vector<8x128xf32>
    %cst_103 = arith.constant dense<0.000000e+00> : vector<1x128xf32>
    %352 = tpu.matmul %349, %351, %cst_103 {dimension_numbers = #tpu.dot_dimension_numbers<[1], [0], [0], [1], [0, 0, 1, 1], [], []>} : vector<1x8xf32>, vector<8x128xf32>, vector<1x128xf32> -> vector<1x128xf32>
    %353 = arith.addf %350, %352 : vector<1x128xf32>
    %c0_104 = arith.constant 0 : index
    %c0_105 = arith.constant 0 : index
    %354 = vector.load %arg20[%c0_104, %c0_105] : memref<1x128xf32, #tpu.memory_space<vmem>>, vector<1x128xf32>
    tpu.vector_store %arg20[%c0_104, %c0_105], %353 {strides = array<i32>} : memref<1x128xf32, #tpu.memory_space<vmem>>, vector<1x128xf32>,
    %c1_i32 = arith.constant 1 : i32
    %355 = arith.cmpi eq, %arg1, %c1_i32 : i32
    %356 = arith.extui %355 : i1 to i32
    %c0_i32_106 = arith.constant 0 : i32
    %357 = arith.cmpi ne, %356, %c0_i32_106 : i32
    scf.if %357 {
      %c0_107 = arith.constant 0 : index
      %c0_108 = arith.constant 0 : index
      %358 = vector.load %arg20[%c0_107, %c0_108] : memref<1x128xf32, #tpu.memory_space<vmem>>, vector<1x128xf32>
      %c0_109 = arith.constant 0 : index
      %c0_110 = arith.constant 0 : index
      %359 = vector.load %arg19[%c0_109, %c0_110] : memref<1x128xf32, #tpu.memory_space<vmem>>, vector<1x128xf32>
      tpu.vector_store %arg19[%c0_109, %c0_110], %358 {strides = array<i32>} : memref<1x128xf32, #tpu.memory_space<vmem>>, vector<1x128xf32>,
    } else {
    }
    return
  }
  func.func @transform_0(%arg0: i32, %arg1: i32) -> (i32, i32, i32) {
    %c0_i32 = arith.constant 0 : i32
    %c0_i32_0 = arith.constant 0 : i32
    %c0_i32_1 = arith.constant 0 : i32
    return %arg0, %c0_i32, %c0_i32_0 : i32, i32, i32
  }
  func.func @transform_1(%arg0: i32, %arg1: i32) -> (i32, i32, i32) {
    %c0_i32 = arith.constant 0 : i32
    %c0_i32_0 = arith.constant 0 : i32
    %c0_i32_1 = arith.constant 0 : i32
    return %arg0, %c0_i32, %c0_i32_0 : i32, i32, i32
  }
  func.func @transform_2(%arg0: i32, %arg1: i32) -> (i32, i32) {
    %c0_i32 = arith.constant 0 : i32
    %c0_i32_0 = arith.constant 0 : i32
    %c0_i32_1 = arith.constant 0 : i32
    return %c0_i32, %c0_i32_0 : i32, i32
  }
  func.func @transform_3(%arg0: i32, %arg1: i32) -> (i32, i32) {
    %c0_i32 = arith.constant 0 : i32
    %c0_i32_0 = arith.constant 0 : i32
    %c0_i32_1 = arith.constant 0 : i32
    return %c0_i32, %c0_i32_0 : i32, i32
  }
  func.func @transform_4(%arg0: i32, %arg1: i32) -> (i32, i32) {
    %c0_i32 = arith.constant 0 : i32
    %c0_i32_0 = arith.constant 0 : i32
    %c0_i32_1 = arith.constant 0 : i32
    return %c0_i32, %c0_i32_0 : i32, i32
  }
  func.func @transform_5(%arg0: i32, %arg1: i32) -> (i32, i32) {
    %c0_i32 = arith.constant 0 : i32
    %c0_i32_0 = arith.constant 0 : i32
    %c0_i32_1 = arith.constant 0 : i32
    return %c0_i32, %c0_i32_0 : i32, i32
  }
  func.func @transform_6(%arg0: i32, %arg1: i32) -> (i32, i32) {
    %c0_i32 = arith.constant 0 : i32
    %c0_i32_0 = arith.constant 0 : i32
    %c0_i32_1 = arith.constant 0 : i32
    return %c0_i32, %c0_i32_0 : i32, i32
  }
  func.func @transform_7(%arg0: i32, %arg1: i32) -> (i32, i32, i32) {
    %c0_i32 = arith.constant 0 : i32
    %c0_i32_0 = arith.constant 0 : i32
    %c0_i32_1 = arith.constant 0 : i32
    return %arg1, %c0_i32, %c0_i32_0 : i32, i32, i32
  }
  func.func @transform_8(%arg0: i32, %arg1: i32) -> (i32, i32, i32) {
    %c0_i32 = arith.constant 0 : i32
    %c0_i32_0 = arith.constant 0 : i32
    %c0_i32_1 = arith.constant 0 : i32
    return %arg1, %c0_i32, %c0_i32_0 : i32, i32, i32
  }
  func.func @transform_9(%arg0: i32, %arg1: i32) -> (i32, i32, i32) {
    %c0_i32 = arith.constant 0 : i32
    %c0_i32_0 = arith.constant 0 : i32
    %c0_i32_1 = arith.constant 0 : i32
    return %arg1, %c0_i32, %c0_i32_0 : i32, i32, i32
  }
  func.func @transform_10(%arg0: i32, %arg1: i32) -> (i32, i32, i32) {
    %c0_i32 = arith.constant 0 : i32
    %c0_i32_0 = arith.constant 0 : i32
    %c0_i32_1 = arith.constant 0 : i32
    return %arg1, %c0_i32, %c0_i32_0 : i32, i32, i32
  }
  func.func @transform_11(%arg0: i32, %arg1: i32) -> (i32, i32, i32) {
    %c0_i32 = arith.constant 0 : i32
    %c0_i32_0 = arith.constant 0 : i32
    %c0_i32_1 = arith.constant 0 : i32
    return %arg1, %c0_i32, %c0_i32_0 : i32, i32, i32
  }
  func.func @transform_12(%arg0: i32, %arg1: i32) -> (i32, i32, i32) {
    %c0_i32 = arith.constant 0 : i32
    %c0_i32_0 = arith.constant 0 : i32
    %c0_i32_1 = arith.constant 0 : i32
    return %arg1, %c0_i32, %c0_i32_0 : i32, i32, i32
  }
  func.func @transform_13(%arg0: i32, %arg1: i32) -> (i32, i32, i32) {
    %c0_i32 = arith.constant 0 : i32
    %c0_i32_0 = arith.constant 0 : i32
    %c0_i32_1 = arith.constant 0 : i32
    return %arg1, %c0_i32, %c0_i32_0 : i32, i32, i32
  }
  func.func @transform_14(%arg0: i32, %arg1: i32) -> (i32, i32, i32) {
    %c0_i32 = arith.constant 0 : i32
    %c0_i32_0 = arith.constant 0 : i32
    %c0_i32_1 = arith.constant 0 : i32
    return %arg1, %c0_i32, %c0_i32_0 : i32, i32, i32
  }
  func.func @transform_15(%arg0: i32, %arg1: i32) -> (i32, i32, i32) {
    %c0_i32 = arith.constant 0 : i32
    %c0_i32_0 = arith.constant 0 : i32
    %c0_i32_1 = arith.constant 0 : i32
    return %arg1, %c0_i32, %c0_i32_0 : i32, i32, i32
  }
  func.func @transform_16(%arg0: i32, %arg1: i32) -> (i32, i32, i32) {
    %c0_i32 = arith.constant 0 : i32
    %c0_i32_0 = arith.constant 0 : i32
    %c0_i32_1 = arith.constant 0 : i32
    return %arg0, %c0_i32, %c0_i32_0 : i32, i32, i32
  }
  func.func @transform_17(%arg0: i32, %arg1: i32) -> (i32, i32) {
    %c0_i32 = arith.constant 0 : i32
    %c0_i32_0 = arith.constant 0 : i32
    return %arg0, %c0_i32 : i32, i32
  }
}

</mosaic_0001>

<bundles_post_ra>
// kernel: iaf_forward.1
= control target key start
LH: loop header
LB: loop body
LE: loop exit
PB: predicated region body
PF: predicated region fallthrough
CT: control target
= control target key end

     0   :  { %s2901_s24 = smov 0   ;;  %s2903_s25 = smov 0   ;;  %s3514_s0 = inlined_call_operand.vmem [shape: f32[1,16,8], index: 0, kind: input, shape index: {}]   ;;  %s3515_s1 = inlined_call_operand.vmem [shape: f32[1,16,8], index: 1, kind: input, shape index: {}]   ;;  %s3516_s2 = inlined_call_operand.vmem [shape: f32[1,16], index: 2, kind: input, shape index: {}]   ;;  %s3517_s3 = inlined_call_operand.vmem [shape: f32[6,5], index: 3, kind: input, shape index: {}]   ;;  %s3518_s4 = inlined_call_operand.vmem [shape: f32[14,112], index: 4, kind: input, shape index: {}]   ;;  %s3519_s5 = inlined_call_operand.vmem [shape: f32[112,8], index: 5, kind: input, shape index: {}]   ;;  %s3520_s6 = inlined_call_operand.vmem [shape: f32[8,128], index: 6, kind: input, shape index: {}]   ;;  %s3521_s7 = inlined_call_operand.vmem [shape: f32[2,8,64], index: 7, kind: input, shape index: {}]   ;;  %s3522_s8 = inlined_call_operand.vmem [shape: f32[2,8,64], index: 8, kind: input, shape index: {}]   ;;  %s3523_s9 = inlined_call_operand.vmem [shape: f32[2,1,64], index: 9, kind: input, shape index: {}]   ;;  %s3524_s10 = inlined_call_operand.vmem [shape: f32[2,64,64], index: 10, kind: input, shape index: {}]   ;;  %s3525_s11 = inlined_call_operand.vmem [shape: f32[2,1,64], index: 11, kind: input, shape index: {}]   ;;  %s3526_s12 = inlined_call_operand.vmem [shape: f32[2,64,64], index: 12, kind: input, shape index: {}]   ;;  %s3527_s13 = inlined_call_operand.vmem [shape: f32[2,1,64], index: 13, kind: input, shape index: {}]   ;;  %s3528_s14 = inlined_call_operand.vmem [shape: f32[2,64,112], index: 14, kind: input, shape index: {}]   ;;  %s3529_s15 = inlined_call_operand.vmem [shape: f32[2,14,8], index: 15, kind: input, shape index: {}]   ;;  %s3530_s16 = inlined_call_operand.vmem [shape: f32[1,16,8], index: 16, kind: output, shape index: {0}]   ;;  %s3531_s17 = inlined_call_operand.vmem [shape: f32[1,128], index: 17, kind: output, shape index: {1}]  }
   0x1   :  { %3537 = sst [smem:[#allocation6_spill]] %s3514_s0  ;;  %s2905_s26 = smov 0  }
   0x2   :  { %3538 = sst [smem:[#allocation7_spill]] %s3515_s1 }
   0x3   :  { %3539 = sst [smem:[#allocation8_spill]] %s3517_s3 }
   0x4   :  { %3540 = sst [smem:[#allocation9_spill]] %s3518_s4 }
   0x5   :  { %3541 = sst [smem:[#allocation10_spill]] %s3520_s6 }
   0x6   :  { %3542 = sst [smem:[#allocation11_spill]] %s3521_s7 }
   0x7   :  { %3543 = sst [smem:[#allocation12_spill]] %s3531_s17 }
   0x8 LB: > { %3544 = sst [smem:[#allocation3_spill]] %s2801_s25  ;;  %s37_s27 = sadd.s32 1, %s2801_s25  ;;  %s2805_s26 = sphi %s2905_s26, %s28_s26   ;;  %s2801_s25 = sphi %s2903_s25, %s3566_s25   ;;  %s2797_s24 = sphi %s2901_s24, %s3565_s24  }
   0x9   : > { %3545 = sst [smem:[#allocation4_spill]] %s2805_s26  ;;  %p2386_p0 = scmp.ge.s32.totalorder %s2805_s26, 1 }
   0xa   : > { %p38_p1 = scmp.ge.s32.totalorder %s37_s27, 2  ;;  %p594_p2 = scmp.lt.s32.totalorder %s2805_s26, 3 }
   0xc   : > { %s3568_s27 = smov (%p38_p1, %s37_s27), 0  ;;  %p595_p3 = pnand %p2386_p0, %p594_p2 }
   0xd   : > { %3546 = sst [smem:[#allocation5_spill]] %s3568_s27  ;;  %p701_p4 = scmp.lt.s32.totalorder (!%p595_p3), %s2797_s24, 1 }
   0xe   : > { %598 = sbr.rel (%p595_p3) target bundleno = 2196 (0x894), region = 84  ;;  %s3547_s7 = sld [smem:[#allocation11_spill]] (!%p595_p3) }
   0xf   : > { %p2397_p5 = scmp.ne.s32.totalorder (!%p595_p3), %s2797_s24, 0 }
  0x15   : > { %s2923_s28 = scalar_select %p701_p4, %s2797_s24, 1 }
  0x16   : > { %749 = sbr.rel (%p2397_p5) target bundleno = 30 (0x1e), region = 88  ;;  %s3548_s30 = sld [smem:[#allocation6_spill]] (!%p2397_p5)  ;;  %vm752_vm0 = vcmask (!%p2397_p5), 64512   ;;  %v2807_v2 = vmov (!%p2397_p5), 0.0  }
  0x17   : > { %s2387_s29 = sshll.u32 %s2923_s28, 3  ;;  %s2440_s27 = sshll.u32 %s2923_s28, 6  ;;  %755 = vst [vmem:[#allocation2] sm:$0x1] (!%p2397_p5), %v2807_v2 }
  0x18   : > { %s704_s20 = scalar_lea.vmem %s3547_s7, %s2387_s29  ;;  %s708_s23 = scalar_lea.vmem %s3522_s8, %s2387_s29 }
  0x19   : > { %s2944_s4 = scalar_lea.vmem %s3524_s10, %s2440_s27  ;;  %s2949_s18 = scalar_lea.vmem %s3526_s12, %s2440_s27 }
  0x1a   : > { %s727_s21 = scalar_lea.vmem %s3527_s13, %s2923_s28  ;;  %s2958_s7 = scalar_lea.vmem %s3528_s14, %s2440_s27 }
  0x1b   : > { %s2443_s25 = sshll.u32 %s2923_s28, 4 }
  0x1c   : > { %s2964_s3 = scalar_lea.vmem %s3529_s15, %s2443_s25  ;;  %v750_v0 = vld [vmem:[%s3548_s30] sm:$0xff] (!%p2397_p5)  ;;  %v751_v1 = vld [vmem:[%s3548_s30 + $0x8] sm:$0xff] (!%p2397_p5) }
  0x1d   : > { %753 = vst.msk [vmem:[%s3530_s16] sm:$0xff] %vm752_vm0, %v750_v0  ;;  %754 = vst.msk [vmem:[%s3530_s16 + $0x8] sm:$0xff] %vm752_vm0, %v751_v1 }
  0x1e PF: > { %v761_v3 = vld [vmem:[%s708_s23] sm:$0xff]  ;;  %vm762_vm1 = vcmask 64512   ;;  %s3549_s1 = sld [smem:[#allocation7_spill]]  ;;  %v937_v9 = vld [vmem:[%s2944_s4 + $0x8] sm:$0xff]  ;;  %v938_v10 = vld [vmem:[%s2944_s4 + $0x10] sm:$0xff]  ;;  %s3550_s22 = scalar_lea.vmem %s3523_s9, %s2923_s28  ;;  %vm951_vm2 = vcmask 523264  }
  0x1f   : > { %2507 = vmatprep.subr.mxu0 %v761_v3  ;;  %v760_v6 = vld [vmem:[%s704_s20] sm:$0xff]  ;;  %v939_v12 = vld [vmem:[%s2944_s4 + $0x18] sm:$0xff]  ;;  %v941_v15 = vld [vmem:[%s2944_s4 + $0x28] sm:$0xff]  ;;  %s3551_s26 = scalar_lea.vmem %s3525_s11, %s2923_s28  ;;  %v2808_v47 = vmov 0.0|0.0   ;;  %vm2809_vm3 = vmmov 0   ;;  %v2810_v48 = vmov 0.0  }
  0x20   : > { %2508 = vmatpush3.msra.mxu0 %v761_v3  ;;  %v936_v8 = vld [vmem:[%s2944_s4] sm:$0xff]  ;;  %v2638_v13 = vpack.c.bf16 %v939_v12, %v938_v10  ;;  %v942_v18 = vld [vmem:[%s2944_s4 + $0x30] sm:$0xff]  ;;  %v943_v19 = vld [vmem:[%s2944_s4 + $0x38] sm:$0xff]  ;;  %vm1134_vm4 = vcmask 130048   ;;  %s3552_s0 = sld [smem:[#allocation9_spill]]  ;;  %vm1313_vm5 = vcmask 916480  }
  0x21   : > { %2512 = vmatprep.subr.mxu0 %v760_v6  ;;  %v2634_v11 = vpack.c.bf16 %v937_v9, %v936_v8  ;;  %v940_v14 = vld [vmem:[%s2944_s4 + $0x20] sm:$0xff]  ;;  %v2646_v20 = vpack.c.bf16 %v943_v19, %v942_v18  ;;  %v1036_v22 = vld [vmem:[%s2949_s18 + $0x8] sm:$0xff]  ;;  %v1037_v23 = vld [vmem:[%s2949_s18 + $0x10] sm:$0xff]  ;;  %vm1500_vm6 = vcmask 58368   ;;  %vm1395_vm7 = vcmask 61440   ;;  %s3553_s19 = sld [smem:[#allocation8_spill]] }
  0x22   : > { %v2642_v16 = vpack.c.bf16 %v941_v15, %v940_v14  ;;  %v1035_v21 = vld [vmem:[%s2949_s18] sm:$0xff]  ;;  %v1038_v25 = vld [vmem:[%s2949_s18 + $0x18] sm:$0xff]  ;;  %v1040_v28 = vld [vmem:[%s2949_s18 + $0x28] sm:$0xff]  ;;  %vm1498_vm8 = vcmask 64517   ;;  %vm1517_vm9 = vcmask 1042432   ;;  %vm1423_vm10 = vcmask 1044480  }
  0x23   : > { %2635 = vmatprep.subr.bf16.mxu1 %v2634_v11  ;;  %v2650_v24 = vpack.c.bf16 %v1036_v22, %v1035_v21  ;;  %v2654_v26 = vpack.c.bf16 %v1038_v25, %v1037_v23  ;;  %v1039_v27 = vld [vmem:[%s2949_s18 + $0x20] sm:$0xff]  ;;  %v1041_v37 = vld [vmem:[%s2949_s18 + $0x30] sm:$0xff]  ;;  %v1042_v38 = vld [vmem:[%s2949_s18 + $0x38] sm:$0xff]  ;;  %vm1419_vm11 = vcmask 39936   ;;  %s3562_s28 = sld [smem:[#allocation10_spill]]  ;;  %p2435_p6 = scmp.ne.s32.totalorder %s2797_s24, 1 }
  0x24   : > { %v2982_v4 = vld [vmem:[%s3530_s16] sm:$0xff]  ;;  %v2987_v5 = vld [vmem:[%s3530_s16 + $0x8] sm:$0xff]  ;;  %2637 = vmatpush3.bf16.msra.mxu1 %v2634_v11  ;;  %v2658_v29 = vpack.c.bf16 %v1040_v28, %v1039_v27  ;;  %v2662_v39 = vpack.c.bf16 %v1042_v38, %v1041_v37  ;;  %v1210_v61 = vld [vmem:[%s2958_s7 + $0x10] sm:$0xff] }
  0x25   : > { %2509 = vmatprep.mubr.msk.f32.mxu0 %vm762_vm1, %v2982_v4  ;;  %v758_v7 = vld [vmem:[%s3549_s1] sm:$0xff]  ;;  %2639 = vmatprep.subr.bf16.mxu1 %v2638_v13  ;;  %v759_v17 = vld [vmem:[%s3549_s1 + $0x8] sm:$0xff]  ;;  %v1211_v62 = vld [vmem:[%s2958_s7 + $0x18] sm:$0xff] }
  0x26   : > { %2510 = vmatmul.mubr.msk.f32.vlgmr.msra.gmra.mrb[0].mxu0 %vm762_vm1, %v2987_v5  ;;  %v2402_v30 = vld [vmem:[%s3550_s22] ss:$0 sm:$0xff]  ;;  %v1209_v57 = vld [vmem:[%s2958_s7 + $0x8] sm:$0xff]  ;;  %v2673_v63 = vpack.c.bf16 %v1211_v62, %v1210_v61  ;;  %v1214_v3 = vld [vmem:[%s2958_s7 + $0x30] sm:$0xff] }
  0x27   : > { %2513 = vmatpush3.msra.mxu0 %v760_v6  ;;  %2514 = vmatprep.mubr.msk.f32.mxu0 %vm762_vm1, %v758_v7  ;;  %v2403_v40 = vld [vmem:[%s3551_s26] ss:$0 sm:$0xff]  ;;  %v1213_v1 = vld [vmem:[%s2958_s7 + $0x28] sm:$0xff]  ;;  %v1215_v6 = vld [vmem:[%s2958_s7 + $0x38] sm:$0xff] }
  0x28   : > { %2641 = vmatpush3.bf16.msra.mxu1 %v2638_v13  ;;  %2651 = vmatprep.subr.bf16.mxu0 %v2650_v24  ;;  %v2406_v49 = vld [vmem:[%s727_s21] ss:$0 sm:$0xff]  ;;  %v2679_v7 = vpack.c.bf16 %v1215_v6, %v1214_v3  ;;  %v1298_v9 = vld [vmem:[%s3519_s5 + $0x8] sm:$0xff]  ;;  %v1299_v10 = vld [vmem:[%s3519_s5 + $0x10] sm:$0xff] }
  0x29   : > { %2643 = vmatprep.subr.bf16.mxu1 %v2642_v16  ;;  %v1208_v56 = vld [vmem:[%s2958_s7] sm:$0xff]  ;;  %v1300_v12 = vld [vmem:[%s3519_s5 + $0x18] sm:$0xff]  ;;  %v1302_v15 = vld [vmem:[%s3519_s5 + $0x28] sm:$0xff] }
  0x2a   : > { %v1133_v59 = vld [vmem:[%s3516_s2] sm:$0x1]  ;;  %v2670_v60 = vpack.c.bf16 %v1209_v57, %v1208_v56  ;;  %v2685_v13 = vpack.c.bf16 %v1300_v12, %v1299_v10  ;;  %v1304_v18 = vld [vmem:[%s3519_s5 + $0x38] sm:$0xff]  ;;  %v1306_v21 = vld [vmem:[%s3519_s5 + $0x48] sm:$0xff] }
  0x2b   : > { %v1212_v0 = vld [vmem:[%s2958_s7 + $0x20] sm:$0xff]  ;;  %v1307_v23 = vld [vmem:[%s3519_s5 + $0x50] sm:$0xff] }
  0x2c   : > { %2645 = vmatpush3.bf16.msra.mxu1 %v2642_v16  ;;  %v2676_v2 = vpack.c.bf16 %v1213_v1, %v1212_v0  ;;  %v1297_v8 = vld [vmem:[%s3519_s5] sm:$0xff] }
  0x2d   : > { %2647 = vmatprep.subr.bf16.mxu1 %v2646_v20  ;;  %v2681_v11 = vpack.c.bf16 %v1298_v9, %v1297_v8  ;;  %v1301_v14 = vld [vmem:[%s3519_s5 + $0x20] sm:$0xff] }
  0x2e   : > { %2515 = vmatmul.mubr.msk.f32.vlgmr.msra.gmra.mrb[0].mxu0 %vm762_vm1, %v759_v17  ;;  %v2689_v16 = vpack.c.bf16 %v1302_v15, %v1301_v14  ;;  %v1303_v17 = vld [vmem:[%s3519_s5 + $0x30] sm:$0xff]  ;;  %v1309_v28 = vld [vmem:[%s3519_s5 + $0x60] sm:$0xff] }
  0x2f   : > { %2653 = vmatpush3.bf16.msra.mxu0 %v2650_v24  ;;  %v2693_v19 = vpack.c.bf16 %v1304_v18, %v1303_v17  ;;  %v1308_v24 = vld [vmem:[%s3519_s5 + $0x58] sm:$0xff] }
  0x30   : > { %2649 = vmatpush3.bf16.msra.mxu1 %v2646_v20  ;;  %2655 = vmatprep.subr.bf16.mxu0 %v2654_v26  ;;  %v1305_v20 = vld [vmem:[%s3519_s5 + $0x40] sm:$0xff]  ;;  %v2701_v25 = vpack.c.bf16 %v1308_v24, %v1307_v23 }
  0x31   : > { %2666 = vmatprep.subr.bf16.mxu1 %v2808_v47  ;;  %v2697_v22 = vpack.c.bf16 %v1306_v21, %v1305_v20 }
  0x33   : > { %2657 = vmatpush3.bf16.msra.mxu0 %v2654_v26 }
  0x34   : > { %2659 = vmatprep.subr.bf16.mxu0 %v2658_v29 }
  0x37   : > { %2661 = vmatpush3.bf16.msra.mxu0 %v2658_v29  ;;  %v1310_v29 = vld [vmem:[%s3519_s5 + $0x68] sm:$0xff] }
  0x38   : > { %2663 = vmatprep.subr.bf16.mxu0 %v2662_v39 }
  0x3b   : > { %2665 = vmatpush3.bf16.msra.mxu0 %v2662_v39 }
  0x3c   : > { %2682 = vmatprep.subr.bf16.mxu0 %v2681_v11 }
 0x101   : > { %v2516_v31 = vpop.f32.mrb[0].mxu0 }
 0x102   : > { %v933_v32 = vadd.f32 %v2516_v31, %v2402_v30  ;;  %v916_v33 = vpop.f32.mrb[1].mxu0  ;;  %v1291_v31 = vlaneseq }
 0x103   : > { %v932_v34 = vadd.f32 %v2402_v30, %v916_v33  ;;  %v2705_v30 = vpack.c.bf16 %v1310_v29, %v1309_v28 }
 0x104   : > { %v935_v36 = vmax.f32 %v933_v32, 0.0  ;;  %v3103_v32 = vshrl.u32 %v1291_v31, 7 }
 0x105   : > { %v934_v35 = vmax.f32 %v932_v34, 0.0 }
 0x106   : > { %v3106_v33 = vsub.s32 0, %v3103_v32 }
 0x107   : > { %2533 = vmatprep.mubr.msk.f32.mxu1 %vm951_vm2, %v934_v35  ;;  %v1289_v35 = vld [vmem:[%s3552_s0] sm:$0xff] }
 0x108   : > { %2534 = vmatmul.mubr.msk.f32.vlgmr.msra.gmra.mrb[0].mxu1 %vm951_vm2, %v935_v36  ;;  %v1290_v36 = vld [vmem:[%s3552_s0 + $0x8] sm:$0x3f] }
 0x109   : > { %2559 = vmatprep.mubr.msk.f32.mxu1 %vm2809_vm3, %v2810_v48 }
 0x1db   : > { %v2535_v41 = vpop.f32.mrb[0].mxu1 }
 0x1dc   : > { %v1030_v42 = vadd.f32 %v2535_v41, %v2403_v40  ;;  %v1024_v43 = vpop.f32.mrb[1].mxu1  ;;  %v1312_v41 = vld [vmem:[%s2964_s3 + $0x8] sm:$0x3f] }
 0x1dd   : > { %v1025_v44 = vadd.f32 %v2403_v40, %v1024_v43 }
 0x1de   : > { %v1034_v46 = vmax.f32 %v1030_v42, 0.0  ;;  %v1311_v42 = vld [vmem:[%s2964_s3] sm:$0xff] }
 0x1df   : > { %v1033_v45 = vmax.f32 %v1025_v44, 0.0 }
 0x1e1   : > { %2552 = vmatprep.mubr.msk.f32.mxu0 %vm951_vm2, %v1033_v45 }
 0x1e2   : > { %2553 = vmatmul.mubr.msk.f32.vlgmr.msra.gmra.mrb[2].mxu0 %vm951_vm2, %v1034_v46 }
 0x1e3   : > { %2684 = vmatpush3.bf16.msra.mxu0 %v2681_v11 }
 0x1e4   : > { %2686 = vmatprep.subr.bf16.mxu0 %v2685_v13 }
 0x1e7   : > { %2688 = vmatpush3.bf16.msra.mxu0 %v2685_v13 }
 0x1e8   : > { %2690 = vmatprep.subr.bf16.mxu0 %v2689_v16 }
 0x1eb   : > { %2692 = vmatpush3.bf16.msra.mxu0 %v2689_v16 }
 0x1ec   : > { %2694 = vmatprep.subr.bf16.mxu0 %v2693_v19 }
 0x1ef   : > { %2696 = vmatpush3.bf16.msra.mxu0 %v2693_v19 }
 0x1f0   : > { %2698 = vmatprep.subr.bf16.mxu0 %v2697_v22 }
 0x1f3   : > { %2700 = vmatpush3.bf16.msra.mxu0 %v2697_v22 }
 0x1f4   : > { %2702 = vmatprep.subr.bf16.mxu0 %v2701_v25 }
 0x1f7   : > { %2704 = vmatpush3.bf16.msra.mxu0 %v2701_v25 }
 0x1f8   : > { %2706 = vmatprep.subr.bf16.mxu0 %v2705_v30 }
 0x1fb   : > { %2708 = vmatpush3.bf16.msra.mxu0 %v2705_v30 }
 0x2b5   : > { %v2554_v50 = vpop.f32.mrb[2].mxu0 }
 0x2b6   : > { %v1128_v51 = vadd.f32 %v2554_v50, %v2406_v49  ;;  %v1122_v52 = vpop.f32.mrb[3].mxu0 }
 0x2b7   : > { %v1123_v53 = vadd.f32 %v2406_v49, %v1122_v52 }
 0x2b8   : > { %v1132_v54 = vmax.f32 %v1128_v51, 0.0 }
 0x2b9   : > { %v1131_v55 = vmax.f32 %v1123_v53, 0.0 }
 0x2bb   : > { %v2667_v58 = vpack.c.bf16 %v1132_v54, %v1131_v55 }
 0x2bd   : > { %2668 = vmatpush3.bf16.msra.mxu1 %v2667_v58 }
 0x2be   : > { %2669 = vmatprep.subr.bf16.mxu1 %v2808_v47 }
 0x2c0   : > { %2560 = vmatmul.mubr.msk.f32.vlgmr.msra.gmra.mrb[2].mxu1 %vm1134_vm4, %v1133_v59 }
 0x2c1   : > { %2671 = vmatpush3.bf16.msra.mxu1 %v2670_v60  ;;  %2578 = vmatprep.mubr.msk.f32.mxu1 %vm2809_vm3, %v2810_v48 }
 0x2c2   : > { %2672 = vmatprep.subr.bf16.mxu1 %v2808_v47 }
 0x2c5   : > { %2674 = vmatpush3.bf16.msra.mxu1 %v2673_v63 }
 0x2c6   : > { %2675 = vmatprep.subr.bf16.mxu1 %v2808_v47 }
 0x2c9   : > { %2677 = vmatpush3.bf16.msra.mxu1 %v2676_v2 }
 0x2ca   : > { %2678 = vmatprep.subr.bf16.mxu1 %v2808_v47 }
 0x2cd   : > { %2680 = vmatpush3.bf16.msra.mxu1 %v2679_v7 }
 0x2ce   : > { %2612 = vmatprep.subr.mxu1 %v2810_v48 }
 0x393   : > { %v1204_v26 = vpop.f32.mrb[2].mxu1 }
 0x394   : > { %v2561_v27 = vpop.f32.mrb[3].mxu1  ;;  %2579 = vmatmul.mubr.msk.f32.vlgmr.msra.gmra.mrb[4].mxu1 %vm951_vm2, %v1204_v26 }
 0x395   : > { %2614 = vmatprep.mubr.msk.f32.mxu1 %vm2809_vm3, %v2810_v48 }
 0x467   : > { %v1285_v34 = vpop.f32.mrb[4].mxu1 }
 0x468   : > { %v1294_v37 = vrot.slane %v1285_v34, %v3106_v33  ;;  %v2580_v38 = vpop.f32.mrb[5].mxu1 }
 0x46a   : > { %v1295_v39 = vmul.f32 %v1294_v37, %v1289_v35  ;;  %v1296_v40 = vmul.f32 %v1294_v37, %v1290_v36  ;;  %v1418_v37 = vld [vmem:[%s3553_s19] sm:$0x3f]  ;;  %s3563_s19 = sld [smem:[#allocation12_spill]] (!%p2435_p6) }
 0x46c   : > { %2609 = vmatprep.mubr.msk.f32.mxu0 %vm1313_vm5, %v1295_v39 }
 0x46d   : > { %2610 = vmatmul.mubr.msk.f32.vlgmr.msra.gmra.mrb[4].mxu0 %vm1313_vm5, %v1296_v40 }
 0x540   : > { %v2611_v43 = vpop.f32.mrb[4].mxu0 }
 0x541   : > { %v3117_v44 = vadd.f32 %v2611_v43, %v1312_v41  ;;  %v1386_v45 = vpop.f32.mrb[5].mxu0 }
 0x542   : > { %v1387_v46 = vadd.f32 %v1386_v45, %v1311_v42 }
 0x543   : > { %v1501_v49 = vsel %vm1500_vm6, %v3117_v44, -inf }
 0x544   : > { %v1396_v50 = vsel %vm1395_vm7, %v1387_v46, -inf  ;;  %v1499_v51 = vsel %vm1498_vm8, %v1387_v46, -inf }
 0x545   : > { %v1397_v52 = vrot.slane %v1396_v50, 4  ;;  %v1502_v53 = vmax.f32 %v1499_v51, %v1501_v49 }
 0x547   : > { %v1398_v54 = vmax.f32 %v1396_v50, %v1397_v52  ;;  %v1503_v55 = vrot.slane %v1502_v53, 4  ;;  %v1618_v52 = vand.u32 2147483647, %v3117_v44 }
 0x549   : > { %v1399_v56 = vrot.slane %v1398_v54, 2  ;;  %v1504_v57 = vmax.f32 %v1502_v53, %v1503_v55  ;;  %v1619_v53 = vsub.f32 0.0, %v1618_v52 }
 0x54b   : > { %v1400_v58 = vmax.f32 %v1398_v54, %v1399_v56  ;;  %v1505_v59 = vrot.slane %v1504_v57, 2  ;;  %v1620_v54 = vmul.f32 1.442695, %v1619_v53 }
 0x54d   : > { %v1401_v60 = vrot.slane %v1400_v58, 1  ;;  %v1506_v61 = vmax.f32 %v1504_v57, %v1505_v59 }
 0x54f   : > { %v1402_v62 = vmax.f32 %v1400_v58, %v1401_v60  ;;  %v1507_v63 = vrot.slane %v1506_v61, 1  ;;  %v1616_v58 = vmax.f32 %v3117_v44, 0.0 }
 0x551   : > { %v1403_v0 = vsub.f32 %v1387_v46, %v1402_v62  ;;  %v1508_v1 = vmax.f32 %v1506_v61, %v1507_v63  ;;  %v1617_v62 = vadd.f32 0.001, %v1616_v58 }
 0x553   : > { %v1404_v2 = vmul.f32 1.442695, %v1403_v0  ;;  %v1509_v3 = vsub.f32 %v1387_v46, %v1508_v1  ;;  %v1510_v6 = vsub.f32 %v3117_v44, %v1508_v1  ;;  %v1676_v0 = vsub.s32 5, %v3103_v32 }
 0x554   : > { %v3155_v1 = vsub.s32 3, %v3103_v32  ;;  %v3164_v44 = vclamps-f32 %v2987_v5, 1.0 }
 0x555   : > { %2743 = vpow2.f32 %v1404_v2  ;;  %v1511_v7 = vmul.f32 1.442695, %v1509_v3  ;;  %v1513_v8 = vmul.f32 1.442695, %v1510_v6  ;;  %v3158_v2 = vsub.s32 4, %v3103_v32 }
 0x556   : > { %v3161_v3 = vclamps-f32 %v2982_v4, 1.0  ;;  %v3167_v6 = vsub.s32 1, %v3103_v32 }
 0x557   : > { %2745 = vpow2.f32 %v1511_v7 }
 0x558   : > { %2747 = vpow2.f32 %v1513_v8 }
 0x55f   : > { %v2744_v9 = vpop.eup %2743 }
 0x560   : > { %v1406_v10 = vsel %vm1395_vm7, %v2744_v9, 0.0 }
 0x561   : > { %v2746_v11 = vpop.eup %2745  ;;  %v1407_v12 = vrot.slane %v1406_v10, 4 }
 0x562   : > { %v2748_v13 = vpop.eup %2747  ;;  %v1518_v14 = vrot.slane %v2746_v11, 5 }
 0x563   : > { %v1408_v15 = vadd.f32 %v1407_v12, %v1406_v10  ;;  %v1519_v16 = vrot.slane %v2748_v13, 5  ;;  %v1782_v10 = vsub.s32 7, %v3103_v32 }
 0x565   : > { %v1409_v17 = vrot.slane %v1408_v15, 2  ;;  %v1520_v18 = vsel %vm1517_vm9, %v1518_v14, %v1519_v16 }
 0x566   : > { %v1522_v19 = vsel %vm1395_vm7, %v1520_v18, 0.0 }
 0x567   : > { %v1410_v20 = vadd.f32 %v1409_v17, %v1408_v15  ;;  %v1523_v21 = vrot.slane %v1522_v19, 4 }
 0x569   : > { %v1411_v22 = vrot.slane %v1410_v20, 1  ;;  %v1524_v23 = vadd.f32 %v1523_v21, %v1522_v19 }
 0x56b   : > { %v1412_v24 = vadd.f32 %v1411_v22, %v1410_v20  ;;  %v1525_v25 = vrot.slane %v1524_v23, 2 }
 0x56d   : > { %2749 = vrcp.f32 %v1412_v24  ;;  %v1526_v26 = vadd.f32 %v1525_v25, %v1524_v23 }
 0x56f   : > { %v1527_v27 = vrot.slane %v1526_v26, 1 }
 0x571   : > { %v1528_v28 = vadd.f32 %v1527_v27, %v1526_v26 }
 0x573   : > { %2751 = vrcp.f32 %v1528_v28 }
 0x574   : > { %2753 = vpow2.f32 %v1620_v54 }
 0x577   : > { %v2750_v29 = vpop.eup %2749 }
 0x578   : > { %v1414_v30 = vmul.f32 %v2750_v29, %v2744_v9  ;;  %v1728_v9 = vsub.s32 6, %v3103_v32 }
 0x57a   : > { %v1415_v31 = vmul.f32 0.995, %v1414_v30 }
 0x57c   : > { %v1416_v34 = vadd.f32 0.001, %v1415_v31 }
 0x57d   : > { %v2752_v35 = vpop.eup %2751 }
 0x57e   : > { %v3125_v36 = vmul.f32 2.0, %v1416_v34  ;;  %v1530_v38 = vmul.f32 %v2752_v35, %v2746_v11  ;;  %v1531_v39 = vmul.f32 %v2752_v35, %v2748_v13  ;;  %v2754_v55 = vpop.eup %2753 }
 0x57f   : > { %v1622_v56 = vadd.f32 1.0, %v2754_v55 }
 0x580   : > { %2613 = vmatpush3.msk.msra.mxu1 %vm1423_vm10, %v3125_v36  ;;  %v1532_v40 = vmul.f32 0.995, %v1530_v38  ;;  %v1533_v41 = vmul.f32 0.995, %v1531_v39  ;;  %v3182_v14 = vrot.slane %v3125_v36, %v3106_v33  ;;  %v3199_v19 = vrot.slane %v3125_v36, %v3167_v6 }
 0x581   : > { %2615 = vmatmul.mubr.msk.f32.vlgmr.msra.gmra.mrb[6].mxu1 %vm1419_vm11, %v1418_v37  ;;  %2617 = vmatprep.subr.mxu1 %v2810_v48  ;;  %2755 = vlog2.f32 %v1622_v56  ;;  %v3207_v21 = vrot.slane %v3125_v36, %v3155_v1  ;;  %v3232_v23 = vrot.slane %v3125_v36, %v3158_v2 }
 0x582   : > { %v1534_v42 = vadd.f32 0.001, %v1532_v40  ;;  %v1535_v43 = vadd.f32 0.001, %v1533_v41  ;;  %2619 = vmatprep.mubr.msk.f32.mxu1 %vm2809_vm3, %v2810_v48 }
 0x584   : > { %v3136_v45 = vmul.f32 2.0, %v1534_v42  ;;  %v3138_v46 = vmul.f32 2.0, %v1535_v43 }
 0x586   : > { %v1540_v49 = vrot.slane %v3136_v45, 5  ;;  %v1541_v50 = vrot.slane %v3138_v46, 5  ;;  %v1677_v18 = vrot.slane %v3136_v45, %v1676_v0  ;;  %v1729_v24 = vrot.slane %v3136_v45, %v1728_v9 }
 0x587   : > { %v3264_v40 = vrot.slane %v3138_v46, %v3106_v33  ;;  %v3278_v52 = vrot.slane %v3138_v46, %v3167_v6 }
 0x588   : > { %v1542_v51 = vsel %vm1517_vm9, %v1540_v49, %v1541_v50 }
 0x589   : > { %2618 = vmatpush3.msk.msra.mxu1 %vm1423_vm10, %v1542_v51 }
 0x58a   : > { %2620 = vmatmul.mubr.msk.f32.vlgmr.msra.gmra.mrb[8].mxu1 %vm1419_vm11, %v1418_v37  ;;  %2709 = vmatprep.subr.bf16.mxu1 %v2808_v47  ;;  %v3151_v47 = vsub.s32 2, %v3103_v32  ;;  %v1783_v37 = vrot.slane %v3136_v45, %v1782_v10 }
 0x58b   : > { %2626 = vmatprep.mubr.msk.f32.mxu1 %vm2809_vm3, %v2810_v48  ;;  %v2756_v57 = vpop.eup %2755 }
 0x58c   : > { %v1624_v61 = vmul.f32 0.6931472, %v2756_v57  ;;  %v3203_v20 = vrot.slane %v3125_v36, %v3151_v47 }
 0x58e   : > { %v1625_v63 = vadd.f32 %v1624_v61, %v1617_v62 }
 0x590   : > { %v1687_v8 = vrot.slane %v1625_v63, %v3151_v47  ;;  %v3173_v13 = vrot.slane %v1625_v63, %v3155_v1  ;;  %v3176_v4 = vrot.slane %v1625_v63, %v3158_v2  ;;  %v3178_v5 = vrot.slane %v1625_v63, %v1676_v0 }
 0x654   : > { %v1493_v59 = vpop.f32.mrb[6].mxu1 }
 0x655   : > { %v2616_v60 = vpop.f32.mrb[7].mxu1  ;;  %v2415_v31 = vadd.f32 -1.0, %v1493_v59 }
 0x657   : > { %v1657_v53 = vrot.slane %v2415_v31, %v3106_v33  ;;  %v1709_v56 = vrot.slane %v2415_v31, %v3167_v6  ;;  %v1763_v57 = vrot.slane %v2415_v31, %v3151_v47  ;;  %v1863_v10 = vrot.slane %v2415_v31, %v3158_v2 }
 0x65d   : > { %v1611_v7 = vpop.f32.mrb[8].mxu1 }
 0x65e   : > { %v2418_v11 = vadd.f32 -1.0, %v1611_v7  ;;  %v2621_v12 = vpop.f32.mrb[9].mxu1 }
 0x660   : > { %v3185_v15 = vrot.slane %v2418_v11, %v3106_v33  ;;  %v3188_v16 = vrot.slane %v2418_v11, %v3167_v6  ;;  %v3191_v32 = vrot.slane %v2418_v11, %v3151_v47  ;;  %v3194_v17 = vrot.slane %v2418_v11, %v3155_v1 }
 0x661   : > { %v3274_v51 = vrot.slane %v2418_v11, %v3158_v2  ;;  %v1817_v6 = vrot.slane %v2415_v31, %v3155_v1 }
 0x662   : > { %vm1640_vm12 = vcmp.ge.f32.partialorder %v3161_v3, %v3185_v15  ;;  %vm1641_vm13 = vcmp.ge.f32.partialorder %v3164_v44, %v3185_v15  ;;  %vm1646_vm14 = vcmp.lt.f32.partialorder %v3161_v3, %v3188_v16  ;;  %vm1647_vm15 = vcmp.lt.f32.partialorder %v3164_v44, %v3188_v16 }
 0x663   : > { %vm1648_vm0 = vmand %vm1640_vm12, %vm1646_vm14  ;;  %vm1692_vm2 = vcmp.ge.f32.partialorder %v3161_v3, %v3188_v16  ;;  %vm1693_vm5 = vcmp.ge.f32.partialorder %v3164_v44, %v3188_v16  ;;  %vm1698_vm6 = vcmp.lt.f32.partialorder %v3161_v3, %v3191_v32  ;;  %vm1699_vm7 = vcmp.lt.f32.partialorder %v3164_v44, %v3191_v32 }
 0x664   : > { %vm1649_vm8 = vmand %vm1641_vm13, %vm1647_vm15  ;;  %v2421_v22 = vsel %vm1648_vm0, 1.0, %v2810_v48  ;;  %vm1746_vm9 = vcmp.ge.f32.partialorder %v3161_v3, %v3191_v32  ;;  %vm1752_vm10 = vcmp.lt.f32.partialorder %v3161_v3, %v3194_v17  ;;  %vm1747_vm13 = vcmp.ge.f32.partialorder %v3164_v44, %v3191_v32 }
 0x665   : > { %v3236_v25 = vsel %vm1649_vm8, 1.0, %v2810_v48  ;;  %v1678_v26 = vmul.f32 %v2421_v22, %v1677_v18  ;;  %v1688_v27 = vmul.f32 %v2421_v22, %v1687_v8  ;;  %vm1700_vm11 = vmand %vm1692_vm2, %vm1698_vm6  ;;  %vm1753_vm15 = vcmp.lt.f32.partialorder %v3164_v44, %v3194_v17 }
 0x666   : > { %v1679_v28 = vmul.f32 %v3236_v25, %v1677_v18  ;;  %v3240_v29 = vmul.f32 %v3236_v25, %v1687_v8  ;;  %vm1701_vm12 = vmand %vm1693_vm5, %vm1699_vm7  ;;  %v2423_v30 = vsel %vm1700_vm11, 1.0, %v2810_v48  ;;  %vm1800_vm2 = vcmp.ge.f32.partialorder %v3161_v3, %v3194_v17 }
 0x667   : > { %v3249_v34 = vsel %vm1701_vm12, 1.0, %v2810_v48  ;;  %v1730_v35 = vmul.f32 %v2423_v30, %v1729_v24  ;;  %v1734_v36 = vmul.f32 %v2423_v30, %v1687_v8  ;;  %vm1754_vm14 = vmand %vm1746_vm9, %vm1752_vm10  ;;  %vm1801_vm5 = vcmp.ge.f32.partialorder %v3164_v44, %v3194_v17 }
 0x668   : > { %v1731_v38 = vmul.f32 %v3249_v34, %v1729_v24  ;;  %v1735_v39 = vmul.f32 %v3249_v34, %v1687_v8  ;;  %vm1755_vm0 = vmand %vm1747_vm13, %vm1753_vm15  ;;  %v3267_v43 = vsel %vm1754_vm14, 1.0, %v2810_v48  ;;  %vm1806_vm6 = vcmp.lt.f32.partialorder %v3161_v3, %v3274_v51 }
 0x669   : > { %v1732_v41 = vadd.f32 %v1730_v35, %v1678_v26  ;;  %v1736_v42 = vadd.f32 %v2421_v22, %v1734_v36  ;;  %v3271_v50 = vsel %vm1755_vm0, 1.0, %v2810_v48  ;;  %v1784_v54 = vmul.f32 %v3267_v43, %v1783_v37  ;;  %vm1808_vm8 = vmand %vm1800_vm2, %vm1806_vm6 }
 0x66a   : > { %v1733_v49 = vadd.f32 %v1731_v38, %v1679_v28  ;;  %v1737_v45 = vadd.f32 %v3236_v25, %v1735_v39  ;;  %v1785_v55 = vmul.f32 %v3271_v50, %v1783_v37  ;;  %v1788_v58 = vmul.f32 %v3267_v43, %v3173_v13 }
 0x66b   : > { %v1789_v59 = vmul.f32 %v3271_v50, %v3173_v13  ;;  %v1786_v60 = vadd.f32 %v1784_v54, %v1732_v41  ;;  %vm1807_vm7 = vcmp.lt.f32.partialorder %v3164_v44, %v3274_v51  ;;  %v1658_v62 = vmul.f32 %v2421_v22, %v1657_v53 }
 0x66c   : > { %v1787_v61 = vadd.f32 %v1785_v55, %v1733_v49  ;;  %v1790_v33 = vadd.f32 %v1788_v58, %v1736_v42  ;;  %v1659_v63 = vmul.f32 %v3236_v25, %v1657_v53  ;;  %v1666_v47 = vmul.f32 %v2421_v22, %v3182_v14  ;;  %vm1809_vm9 = vmand %vm1801_vm5, %vm1807_vm7 }
 0x66d   : > { %v1791_v46 = vadd.f32 %v1789_v59, %v1737_v45  ;;  %v1667_v0 = vmul.f32 %v3236_v25, %v3182_v14  ;;  %v1710_v7 = vmul.f32 %v2423_v30, %v1709_v56  ;;  %v1711_v8 = vmul.f32 %v3249_v34, %v1709_v56 }
 0x66e   : > { %v1718_v9 = vmul.f32 %v2423_v30, %v3199_v19  ;;  %v1670_v11 = vmul.f32 %v2421_v22, %v3185_v15  ;;  %v1719_v12 = vmul.f32 %v3249_v34, %v3199_v19  ;;  %v1742_v14 = vmul.f32 %v2423_v30, %v3173_v13 }
 0x66f   : > { %v1722_v1 = vmul.f32 %v2423_v30, %v3188_v16  ;;  %v1712_v18 = vadd.f32 %v1710_v7, %v1658_v62  ;;  %v1713_v24 = vadd.f32 %v1711_v8, %v1659_v63  ;;  %v3314_v28 = vsel %vm1808_vm8, 1.0, %v2810_v48 }
 0x670   : > { %v1720_v26 = vadd.f32 %v1718_v9, %v1666_v47  ;;  %v1721_v2 = vadd.f32 %v1719_v12, %v1667_v0  ;;  %v1743_v22 = vmul.f32 %v3249_v34, %v3173_v13  ;;  %v1744_v31 = vadd.f32 %v1742_v14, %v1688_v27 }
 0x671   : > { %v3319_v35 = vsel %vm1809_vm9, 1.0, %v2810_v48  ;;  %v1764_v19 = vmul.f32 %v3267_v43, %v1763_v57  ;;  %v1765_v36 = vmul.f32 %v3271_v50, %v1763_v57  ;;  %v1772_v30 = vmul.f32 %v3267_v43, %v3203_v20 }
 0x672   : > { %v1745_v37 = vadd.f32 %v1743_v22, %v3240_v29  ;;  %v1773_v38 = vmul.f32 %v3271_v50, %v3203_v20  ;;  %v1796_v39 = vmul.f32 %v3267_v43, %v3176_v4  ;;  %v1797_v13 = vmul.f32 %v3271_v50, %v3176_v4 }
 0x673   : > { %v1766_v27 = vadd.f32 %v1764_v19, %v1712_v18  ;;  %v1767_v41 = vadd.f32 %v1765_v36, %v1713_v24  ;;  %v1774_v42 = vadd.f32 %v1772_v30, %v1720_v26  ;;  %v1818_v49 = vmul.f32 %v3314_v28, %v1817_v6 }
 0x674   : > { %v1775_v45 = vadd.f32 %v1773_v38, %v1721_v2  ;;  %v1798_v53 = vadd.f32 %v1796_v39, %v1744_v31  ;;  %v1799_v54 = vadd.f32 %v1797_v13, %v1745_v37  ;;  %v1819_v55 = vmul.f32 %v3319_v35, %v1817_v6 }
 0x675   : > { %v1820_v29 = vadd.f32 %v1818_v49, %v1766_v27  ;;  %v1826_v20 = vmul.f32 %v3314_v28, %v3207_v21  ;;  %v1827_v56 = vmul.f32 %v3319_v35, %v3207_v21  ;;  %v1838_v57 = vmul.f32 %v3314_v28, %v3264_v40 }
 0x676   : > { %v1821_v58 = vadd.f32 %v1819_v55, %v1767_v41  ;;  %v1839_v59 = vmul.f32 %v3319_v35, %v3264_v40  ;;  %v1842_v62 = vmul.f32 %v3314_v28, %v3176_v4  ;;  %v1843_v63 = vmul.f32 %v3319_v35, %v3176_v4 }
 0x677   : > { %v1828_v47 = vadd.f32 %v1826_v20, %v1774_v42  ;;  %v1829_v0 = vadd.f32 %v1827_v56, %v1775_v45  ;;  %v1840_v6 = vadd.f32 %v1838_v57, %v1786_v60  ;;  %v1850_v7 = vmul.f32 %v3314_v28, %v3178_v5 }
 0x678   : > { %v1841_v21 = vadd.f32 %v1839_v59, %v1787_v61  ;;  %v1844_v8 = vadd.f32 %v1842_v62, %v1790_v33  ;;  %v1845_v9 = vadd.f32 %v1843_v63, %v1791_v46  ;;  %v1851_v12 = vmul.f32 %v3319_v35, %v3178_v5 }
 0x679   : > { %v1671_v40 = vmul.f32 %v3236_v25, %v3185_v15  ;;  %v1852_v14 = vadd.f32 %v1850_v7, %v1798_v53  ;;  %vm1854_vm10 = vcmp.ge.f32.partialorder %v3161_v3, %v3274_v51  ;;  %vm1855_vm11 = vcmp.ge.f32.partialorder %v3164_v44, %v3274_v51 }
 0x67a   : > { %v1723_v4 = vmul.f32 %v3249_v34, %v3188_v16  ;;  %v1853_v60 = vadd.f32 %v1851_v12, %v1799_v54  ;;  %v2429_v61 = vsel %vm1854_vm10, 1.0, %v2810_v48  ;;  %v2430_v33 = vsel %vm1855_vm11, 1.0, %v2810_v48 }
 0x67b   : > { %v1864_v46 = vmul.f32 %v2429_v61, %v1863_v10  ;;  %v1865_v18 = vmul.f32 %v2430_v33, %v1863_v10  ;;  %v1872_v24 = vmul.f32 %v2429_v61, %v3232_v23  ;;  %v1873_v15 = vmul.f32 %v2430_v33, %v3232_v23 }
 0x67c   : > { %v1724_v25 = vadd.f32 %v1722_v1, %v1670_v11  ;;  %v1884_v26 = vmul.f32 %v2429_v61, %v3278_v52  ;;  %v1885_v2 = vmul.f32 %v2430_v33, %v3278_v52  ;;  %v1725_v19 = vadd.f32 %v1723_v4, %v1671_v40 }
 0x67d   : > { %v3364_v22 = vadd.f32 %v1864_v46, %v1820_v29  ;;  %v3366_v31 = vadd.f32 %v1865_v18, %v1821_v58  ;;  %v3368_v16 = vadd.f32 %v1872_v24, %v1828_v47  ;;  %v3370_v34 = vadd.f32 %v1873_v15, %v1829_v0 }
 0x67e   : > { %v1776_v10 = vmul.f32 %v3267_v43, %v3191_v32  ;;  %v1886_v36 = vadd.f32 %v1884_v26, %v1840_v6  ;;  %v1887_v30 = vadd.f32 %v1885_v2, %v1841_v21  ;;  %v1888_v23 = vmul.f32 %v2429_v61, %v3178_v5 }
 0x67f   : > { %v1889_v11 = vmul.f32 %v2430_v33, %v3178_v5  ;;  %v3376_v1 = vadd.f32 %v2429_v61, %v1852_v14  ;;  %v3378_v52 = vadd.f32 %v2430_v33, %v1853_v60  ;;  %v1777_v37 = vmul.f32 %v3271_v50, %v3191_v32 }
 0x680   : > { %2757 = vrcp.f32 %v3368_v16  ;;  %v1778_v38 = vadd.f32 %v1776_v10, %v1724_v25  ;;  %v3383_v39 = vadd.f32 %v1888_v23, %v1844_v8  ;;  %v1830_v5 = vmul.f32 %v3314_v28, %v3194_v17 }
 0x681   : > { %v3385_v13 = vadd.f32 %v1889_v11, %v1845_v9  ;;  %2759 = vrcp.f32 %v3370_v34  ;;  %v1779_v43 = vadd.f32 %v1777_v37, %v1725_v19  ;;  %v1831_v42 = vmul.f32 %v3319_v35, %v3194_v17 }
 0x682   : > { %v1900_v27 = vadd.f32 %v3376_v1, %v3383_v39  ;;  %v1914_v32 = vmul.f32 %v3383_v39, %v1886_v36  ;;  %v1832_v49 = vadd.f32 %v1830_v5, %v1778_v38  ;;  %v1876_v53 = vmul.f32 %v2429_v61, %v3274_v51 }
 0x683   : > { %v1901_v41 = vadd.f32 %v3378_v52, %v3385_v13  ;;  %v1915_v50 = vmul.f32 %v3385_v13, %v1887_v30  ;;  %v1833_v45 = vadd.f32 %v1831_v42, %v1779_v43  ;;  %v1877_v54 = vmul.f32 %v2430_v33, %v3274_v51 }
 0x684   : > { %v1878_v28 = vadd.f32 %v1876_v53, %v1832_v49 }
 0x685   : > { %v1879_v29 = vadd.f32 %v1877_v54, %v1833_v45 }
 0x686   : > { %v1898_v58 = vsub.f32 %v3161_v3, %v1878_v28 }
 0x687   : > { %v1899_v51 = vsub.f32 %v3164_v44, %v1879_v29 }
 0x68a   : > { %v2758_v55 = vpop.eup %2757 }
 0x68b   : > { %v2760_v20 = vpop.eup %2759  ;;  %v3400_v56 = vmul.f32 %v2758_v55, %v1886_v36 }
 0x68c   : > { %v3402_v57 = vmul.f32 %v2760_v20, %v1887_v30 }
 0x68d   : > { %v3406_v59 = vmul.f32 2.0, %v3400_v56  ;;  %v1908_v17 = vsub.f32 %v3400_v56, %v3383_v39  ;;  %v1918_v35 = vsub.f32 0.0, %v3400_v56 }
 0x68e   : > { %v3413_v62 = vmul.f32 2.0, %v3402_v57  ;;  %v1909_v63 = vsub.f32 %v3402_v57, %v3385_v13  ;;  %v1919_v47 = vsub.f32 0.0, %v3402_v57 }
 0x68f   : > { %v3419_v3 = vsub.f32 %v1900_v27, %v3406_v59  ;;  %v1910_v0 = vmul.f32 %v1908_v17, %v1886_v36  ;;  %v1920_v6 = vmul.f32 %v1918_v35, %v1898_v58 }
 0x690   : > { %v3422_v7 = vsub.f32 %v1901_v41, %v3413_v62  ;;  %v1911_v21 = vmul.f32 %v1909_v63, %v1887_v30  ;;  %v1921_v8 = vmul.f32 %v1919_v47, %v1899_v51 }
 0x691   : > { %v1906_v44 = vmul.f32 %v3419_v3, %v1898_v58  ;;  %v1960_v23 = vsub.f32 0.0, %v1920_v6 }
 0x692   : > { %v1907_v9 = vmul.f32 %v3422_v7, %v1899_v51  ;;  %v1961_v37 = vsub.f32 0.0, %v1921_v8 }
 0x693   : > { %v1912_v12 = vadd.f32 %v1910_v0, %v1906_v44  ;;  %v1916_v40 = vsub.f32 %v1914_v32, %v1906_v44 }
 0x694   : > { %v1913_v14 = vadd.f32 %v1911_v21, %v1907_v9  ;;  %v1917_v4 = vsub.f32 %v1915_v50, %v1907_v9  ;;  %v1966_v21 = vmul.f32 2.0, %v1920_v6  ;;  %v1967_v9 = vmul.f32 2.0, %v1921_v8 }
 0x695   : > { %v1924_v60 = vmul.f32 4.0, %v1912_v12  ;;  %v1954_v61 = vand.u32 2147483647, %v1916_v40  ;;  %v1922_v18 = vmul.f32 %v1916_v40, %v1916_v40  ;;  %v1932_v50 = vsub.f32 0.0, %v1916_v40 }
 0x696   : > { %v1925_v33 = vmul.f32 4.0, %v1913_v14  ;;  %v1955_v46 = vand.u32 2147483647, %v1917_v4  ;;  %v1923_v15 = vmul.f32 %v1917_v4, %v1917_v4  ;;  %v1933_v54 = vsub.f32 0.0, %v1917_v4  ;;  %v2781_v14 = vld [vmem:[%s3530_s16] sm:$0xff] }
 0x697   : > { %v1926_v24 = vmul.f32 %v1924_v60, %v1920_v6  ;;  %vm1956_vm12 = vcmp.lt.f32.partialorder %v1954_v61, 1e-12  ;;  %vm1626_vm7 = vcmp.ge.f32.partialorder %v2781_v14, -1.0  ;;  %vm1628_vm8 = vcmp.le.f32.partialorder %v2781_v14, 1.0  ;;  %v2782_v60 = vld [vmem:[%s3530_s16 + $0x8] sm:$0xff] }
 0x698   : > { %v1927_v25 = vmul.f32 %v1925_v33, %v1921_v8  ;;  %vm1957_vm13 = vcmp.lt.f32.partialorder %v1955_v46, 1e-12  ;;  %v1958_v26 = vsel %vm1956_vm12, 1.0, %v1916_v40  ;;  %vm1627_vm9 = vcmp.ge.f32.partialorder %v2782_v60, -1.0  ;;  %vm3450_vm11 = vmand %vm1626_vm7, %vm1628_vm8 }
 0x699   : > { %v1928_v2 = vsub.f32 %v1922_v18, %v1926_v24  ;;  %v1959_v19 = vsel %vm1957_vm13, 1.0, %v1917_v4  ;;  %2761 = vrcp.f32 %v1958_v26  ;;  %vm1629_vm10 = vcmp.le.f32.partialorder %v2782_v60, 1.0 }
 0x69a   : > { %v1929_v10 = vsub.f32 %v1923_v15, %v1927_v25  ;;  %2763 = vrcp.f32 %v1959_v19  ;;  %vm3456_vm12 = vmand %vm1627_vm9, %vm1629_vm10 }
 0x69b   : > { %v1930_v36 = vmax.f32 %v1928_v2, 0.0  ;;  %vm2711_vm13 = vmpackc.low %vm3456_vm12, %vm3450_vm11 }
 0x69c   : > { %v1931_v30 = vmax.f32 %v1929_v10, 0.0 }
 0x69d   : > { %2765 = vrsqrt.f32 %v1930_v36  ;;  %vm1936_vm14 = vcmp.eq.f32.partialorder %v1930_v36, inf  ;;  %v1939_v42 = vand.u32 2147483648, %v1930_v36  ;;  %vm1938_vm15 = vcmp.eq.f32.partialorder %v1930_v36, 0.0 }
 0x69e   : > { %2767 = vrsqrt.f32 %v1931_v30  ;;  %vm1943_vm0 = vcmp.eq.f32.partialorder %v1931_v30, inf  ;;  %v1946_v53 = vand.u32 2147483648, %v1931_v30  ;;  %vm1945_vm2 = vcmp.eq.f32.partialorder %v1931_v30, 0.0 }
 0x6a3   : > { %v2762_v11 = vpop.eup %2761 }
 0x6a4   : > { %v2764_v38 = vpop.eup %2763  ;;  %v1963_v43 = vmul.f32 %v2762_v11, %v1960_v23 }
 0x6a5   : > { %v1965_v5 = vmul.f32 %v2764_v38, %v1961_v37 }
 0x6a7   : > { %v2766_v27 = vpop.eup %2765 }
 0x6a8   : > { %v2768_v41 = vpop.eup %2767  ;;  %v1935_v32 = vmul.f32 %v2766_v27, %v1930_v36 }
 0x6a9   : > { %v1942_v49 = vmul.f32 %v2768_v41, %v1931_v30 }
 0x6aa   : > { %v1937_v45 = vsel %vm1936_vm14, %v1930_v36, %v1935_v32 }
 0x6ab   : > { %v1940_v28 = vsel %vm1938_vm15, %v1939_v42, %v1937_v45  ;;  %v1944_v55 = vsel %vm1943_vm0, %v1931_v30, %v1942_v49 }
 0x6ac   : > { %v1947_v29 = vsel %vm1945_vm2, %v1946_v53, %v1944_v55  ;;  %v1948_v20 = vsub.f32 %v1932_v50, %v1940_v28 }
 0x6ad   : > { %v1949_v58 = vsub.f32 %v1933_v54, %v1947_v29 }
 0x6ae   : > { %v1950_v17 = vand.u32 2147483647, %v1948_v20 }
 0x6af   : > { %v1951_v35 = vand.u32 2147483647, %v1949_v58 }
 0x6b0   : > { %vm3426_vm5 = vcmp.lt.f32.partialorder %v1950_v17, 1e-12  ;;  %v2024_v17 = vld [vmem:[%s3516_s2] sm:$0x1] }
 0x6b1   : > { %vm3430_vm6 = vcmp.lt.f32.partialorder %v1951_v35, 1e-12  ;;  %v1968_v47 = vsel %vm3426_vm5, 1.0, %v1948_v20  ;;  %v2099_v35 = vld [vmem:[%s3562_s28] sm:$0xff] }
 0x6b2   : > { %v1969_v0 = vsel %vm3430_vm6, 1.0, %v1949_v58  ;;  %2769 = vrcp.f32 %v1968_v47  ;;  %v2098_v47 = vld [vmem:[#allocation2] sm:$0x1] }
 0x6b3   : > { %2771 = vrcp.f32 %v1969_v0 }
 0x6bc   : > { %v2770_v44 = vpop.eup %2769 }
 0x6bd   : > { %v2772_v12 = vpop.eup %2771  ;;  %v1972_v40 = vmul.f32 %v2770_v44, %v1966_v21 }
 0x6be   : > { %v1973_v4 = vmul.f32 %v2772_v12, %v1967_v9 }
 0x6bf   : > { %v1974_v6 = vsel %vm3426_vm5, %v1963_v43, %v1972_v40 }
 0x6c0   : > { %v1975_v8 = vsel %vm3430_vm6, %v1965_v5, %v1973_v4  ;;  %v1976_v61 = vsub.f32 1.0, %v1974_v6  ;;  %v1986_v33 = vmul.f32 %v1974_v6, %v3376_v1  ;;  %v2014_v46 = vmul.f32 %v1974_v6, %v3368_v16 }
 0x6c1   : > { %v1977_v24 = vsub.f32 1.0, %v1975_v8  ;;  %v1987_v15 = vmul.f32 %v1975_v8, %v3378_v52  ;;  %v2015_v25 = vmul.f32 %v1975_v8, %v3370_v34  ;;  %v1985_v5 = vmul.f32 %v3402_v57, %v3402_v57 }
 0x6c2   : > { %v1978_v2 = vmul.f32 %v1976_v61, %v1974_v6  ;;  %v1988_v19 = vmul.f32 %v1986_v33, %v1974_v6  ;;  %v1994_v10 = vmul.f32 %v1976_v61, %v3383_v39  ;;  %v2016_v1 = vadd.f32 %v2014_v46, %v3364_v22 }
 0x6c3   : > { %v1979_v16 = vmul.f32 %v1977_v24, %v1975_v8  ;;  %v1989_v36 = vmul.f32 %v1987_v15, %v1975_v8  ;;  %v1995_v30 = vmul.f32 %v1977_v24, %v3385_v13  ;;  %v2017_v23 = vadd.f32 %v2015_v25, %v3366_v31 }
 0x6c4   : > { %v1980_v52 = vmul.f32 %v1978_v2, %v3419_v3  ;;  %v1990_v34 = vmul.f32 %v1978_v2, %v3406_v59  ;;  %v1996_v11 = vmul.f32 %v1994_v10, %v1976_v61  ;;  %v2018_v37 = vsel %vm3450_vm11, %v2016_v1, %v2781_v14 }
 0x6c5   : > { %v1981_v38 = vmul.f32 %v1979_v16, %v3422_v7  ;;  %v1991_v39 = vmul.f32 %v1979_v16, %v3413_v62  ;;  %v1997_v43 = vmul.f32 %v1995_v30, %v1977_v24  ;;  %v2019_v22 = vsel %vm3456_vm12, %v2017_v23, %v2782_v60  ;;  %2022 = vst.msk [vmem:[%s3530_s16] sm:$0xff] %vm762_vm1, %v2018_v37 }
 0x6c6   : > { %v1982_v31 = vadd.f32 %v1980_v52, %v3400_v56  ;;  %v1992_v13 = vadd.f32 %v1990_v34, %v1988_v19  ;;  %2023 = vst.msk [vmem:[%s3530_s16 + $0x8] sm:$0xff] %vm762_vm1, %v2019_v22  ;;  %v1984_v3 = vmul.f32 %v3400_v56, %v3400_v56 }
 0x6c7   : > { %v1983_v59 = vadd.f32 %v1981_v38, %v3402_v57  ;;  %v1993_v62 = vadd.f32 %v1991_v39, %v1989_v36 }
 0x6c8   : > { %v1998_v7 = vadd.f32 %v1996_v11, %v1992_v13  ;;  %2773 = vlog2.f32 %v1982_v31 }
 0x6c9   : > { %v1999_v27 = vadd.f32 %v1997_v43, %v1993_v62  ;;  %2775 = vlog2.f32 %v1983_v59 }
 0x6ca   : > { %v2000_v41 = vmul.f32 %v1998_v7, %v1984_v3 }
 0x6cb   : > { %v2001_v32 = vmul.f32 %v1999_v27, %v1985_v5 }
 0x6cc   : > { %2777 = vlog2.f32 %v2000_v41 }
 0x6cd   : > { %2779 = vlog2.f32 %v2001_v32 }
 0x6d2   : > { %v2774_v50 = vpop.eup %2773 }
 0x6d3   : > { %v2776_v42 = vpop.eup %2775  ;;  %v2003_v49 = vmul.f32 0.6931472, %v2774_v50 }
 0x6d4   : > { %v2005_v45 = vmul.f32 0.6931472, %v2776_v42 }
 0x6d5   : > { %v2006_v28 = vmul.f32 2.0, %v2003_v49 }
 0x6d6   : > { %v2778_v53 = vpop.eup %2777  ;;  %v2007_v56 = vmul.f32 2.0, %v2005_v45 }
 0x6d7   : > { %v2780_v54 = vpop.eup %2779  ;;  %v2009_v55 = vmul.f32 0.6931472, %v2778_v53 }
 0x6d8   : > { %v2011_v29 = vmul.f32 0.6931472, %v2780_v54 }
 0x6d9   : > { %v2012_v20 = vsub.f32 %v2006_v28, %v2009_v55 }
 0x6da   : > { %v2013_v58 = vsub.f32 %v2007_v56, %v2011_v29 }
 0x6dc   : > { %v2710_v57 = vpack.c.bf16 %v2013_v58, %v2012_v20 }
 0x6de   : > { %2712 = vmatpush3.bf16.msk.msra.mxu1 %vm2711_vm13, %v2710_v57 }
 0x6df   : > { %2629 = vmatprep.subr.mxu1 %v2810_v48 }
 0x6e1   : > { %2627 = vmatmul.mubr.msk.f32.vlgmr.msra.gmra.mrb[10].mxu1 %vm1134_vm4, %v2024_v17 }
 0x6e2   : > { %2630 = vmatpush3.msra.mxu1 %v2099_v35  ;;  %2631 = vmatprep.mubr.msk.f32.mxu1 %vm2809_vm3, %v2810_v48 }
 0x7b4   : > { %v2094_v51 = vpop.f32.mrb[10].mxu1 }
 0x7b5   : > { %v2628_v63 = vpop.f32.mrb[11].mxu1  ;;  %2632 = vmatmul.mubr.msk.f32.vlgmr.msra.gmra.mrb[12].mxu1 %vm762_vm1, %v2094_v51 }
 0x885   : > { %2178 = sbr.rel (%p2435_p6) target bundleno = 2196 (0x894), region = 92 }
 0x888   : > { %v2169_v0 = vpop.f32.mrb[12].mxu1 }
 0x889   : > { %v2173_v21 = vadd.f32 %v2169_v0, %v2098_v47  ;;  %v2633_v44 = vpop.f32.mrb[13].mxu1 }
 0x88b   : > { %2174 = vst [vmem:[#allocation2] sm:$0x1] %v2173_v21 }
 0x892   : > { %v2179_v9 = vld [vmem:[#allocation2] sm:$0x1] }
 0x893   : > { %2180 = vst [vmem:[%s3563_s19] sm:$0x1] %v2179_v9 }
 0x894 PF: > { %s3564_s20 = sld [smem:[#allocation4_spill]]  ;;  %s3565_s24 = sld [smem:[#allocation3_spill]] }
 0x895   : > { %s3566_s25 = sld [smem:[#allocation5_spill]] }
 0x89a   : > { %s28_s26 = sadd.s32 1, %s3564_s20  }
 0x89b   : > { %p25_p7 = scmp.ge.s32.totalorder %s28_s26, 4  }
 0x89d   :  { %27 = sbr.rel (!%p25_p7) target bundleno = 8 (0x8), region = 164 }

</bundles_post_ra>
